<compile_context>
chip_gen: v6e
topology: v6e:2x2x1
jax: 0.10.0
libtpu: 0.0.40
codegen_flags: <defaults>
</compile_context>

<pallas_src>
import functools

import jax
import jax.numpy as jnp
from jax import lax
from jax.experimental import pallas as pl
from jax.experimental.pallas import tpu as pltpu


def _round_up(a: int, b: int) -> int:
    return (a + b - 1) // b * b


def _vmem_capacity_bytes() -> int:
    """Physical per-TC VMEM (64 MiB v7x, 128 MiB v5e/v6e); safe fallback."""
    try:
        cap = int(getattr(pltpu.get_tpu_info(), "vmem_capacity_bytes", 0))
        if cap > 0:
            return cap
    except Exception:
        pass
    return 128 * 1024 * 1024


def _pick_tv(V: int, D: int, budget: int) -> int:
    """Vocab tile: multiple of 128, weight double-buffer (2*tv*D*2B) kept small."""
    wcap = min(8 << 20, max(budget // 4, 1 << 20))
    cands = [c for c in (2048, 1024, 512, 256, 128) if 4 * c * D <= wcap] or [128]
    for c in cands:
        if V % c == 0:
            return c            # no vocab padding needed
    return cands[0]             # vocab gets zero-padded (masked to -inf in kernel)


def _pick_tm(M: int, D: int, V_pad: int, tv: int, nv: int, budget: int,
             out_buffers: int, out_bytes: int) -> int:
    """Largest row tile that fits the VMEM budget; target ~512 for MXU-bound
    weight streaming on v6e/v7x; keep >= 2 row tiles for megacore."""
    fixed = 4 * tv * D                               # weight tile, bf16, 2 buffers
    per_row = (out_buffers * V_pad * out_bytes       # resident output block
               + 4 * D                               # x tile, bf16, 2 buffers
               + 16 * tv                             # per-step f32 temporaries
               + (nv + 2) * 512)                     # softmax scratch (lane-padded)
    cap = max(8, (max(budget - fixed, 0) // per_row) // 8 * 8)
    tm = min(512, cap, _round_up(M, 8))
    if M > 8:                                        # megacore: >= 2 row tiles (v7x)
        tm = min(tm, max(8, _round_up(_round_up(M, 8) // 2, 8)))
    return max(8, tm // 8 * 8)


def _proj_softmax_kernel(x_ref, w_ref, o_ref, m_ref, s_ref, mt_ref,
                         *, tv: int, nv: int, v_valid):
    # x_ref : (tm, D)     bf16 VMEM, resident across the vocab sweep
    # w_ref : (tv, D)     bf16 VMEM, streamed vocab tile (PyTorch (V, D) layout)
    # o_ref : (tm, V_pad) f32  VMEM, resident output block
    # m_ref : (tm, 1)     f32  running max
    # s_ref : (tm, 1)     f32  running (rescaled) sum
    # mt_ref: (nv, tm, 1) f32  per-tile maxima for the final rescale
    j = pl.program_id(1)

    @pl.when(j == 0)
    def _():
        m_ref[...] = jnp.full(m_ref.shape, -jnp.inf, m_ref.dtype)
        s_ref[...] = jnp.zeros(s_ref.shape, s_ref.dtype)

    # logits_j = x @ w_j.T : contract d_model of (tm, D) with d_model of (tv, D).
    # The rhs is fed to the MXU transposed in-flight (no per-step XLU transpose;
    # the weight stays in its natural (V, D) layout in HBM).
    logits = lax.dot_general(
        x_ref[...], w_ref[...],
        dimension_numbers=(((1,), (1,)), ((), ())),
        preferred_element_type=jnp.float32,
    )

    if v_valid is not None:  # zero-padded vocab columns -> -inf before softmax
        col = j * tv + lax.broadcasted_iota(jnp.int32, logits.shape, 1)
        logits = jnp.where(col < v_valid, logits, -jnp.inf)

    # Online softmax statistics (hidden under the MXU-bound vocab sweep).
    m_prev = m_ref[...]
    m_new = jnp.maximum(m_prev, jnp.max(logits, axis=-1, keepdims=True))
    p = jnp.exp(logits - m_new)
    s_ref[...] = s_ref[...] * jnp.exp(m_prev - m_new) + jnp.sum(p, axis=-1,
                                                                keepdims=True)
    m_ref[...] = m_new
    mt_ref[j] = m_new                       # per-tile max for the final rescale

    if nv == 1:
        o_ref[...] = p
    else:
        off = pl.multiple_of(j * tv, 128)   # aligned, lane-dense stores
        o_ref[:, pl.ds(off, tv)] = p

    # Last vocab tile: all exp-values are resident; finish with a single
    # per-tile VPU rescale pass (no more reductions / big exp here).
    @pl.when(j == nv - 1)
    def _():
        inv_s = pl.reciprocal(s_ref[...], approx=True)
        m_fin = m_ref[...]
        if nv <= 32:
            # nv is static: unroll with static, lane-dense slices.
            for jj in range(nv):
                scale = jnp.exp(mt_ref[jj] - m_fin) * inv_s
                o_ref[:, jj * tv:(jj + 1) * tv] = (
                    o_ref[:, jj * tv:(jj + 1) * tv] * scale)
        else:
            def body(jj, carry):
                offj = pl.multiple_of(jj * tv, 128)
                scale = jnp.exp(mt_ref[jj] - m_fin) * inv_s
                o_ref[:, pl.ds(offj, tv)] = o_ref[:, pl.ds(offj, tv)] * scale
                return carry
            lax.fori_loop(0, nv, body, 0)


def projection_layer(x, weight, *, tm: int | None = None, tv: int | None = None):
    """x: (B, S, d_model); weight: (vocab_size, d_model) (PyTorch layout).

    Returns softmax(x @ weight.T, axis=-1) with shape (B, S, vocab_size), f32.
    Pass the weight already in bfloat16 (cast once at parameter load).
    """
    B, S, D = x.shape
    V, D_w = weight.shape
    assert D == D_w
    M = B * S

    # Weight should already be bf16 (parameter-load-time cast); only cast here
    # if the caller did not — that costs an extra V*D HBM pass per call.
    w = weight if weight.dtype == jnp.bfloat16 else weight.astype(jnp.bfloat16)
    x2d = x.reshape(M, D).astype(jnp.bfloat16)

    cap = _vmem_capacity_bytes()
    budget = int(cap * 0.72)    # ~46 MiB on v7x (64 MiB/TC), ~92 MiB on v5e/v6e

    tv_eff = tv if tv is not None else _pick_tv(V, D, budget)
    assert tv_eff % 128 == 0
    V_pad = _round_up(V, tv_eff)
    nv = V_pad // tv_eff
    if V_pad != V:
        w = jnp.pad(w, ((0, V_pad - V), (0, 0)))   # masked to -inf in the kernel

    out_bytes = 4    # f32 output matches the PyTorch module (bf16 is an option)
    out_buffers = 2
    if tm is None:
        tm_eff = _pick_tm(M, D, V_pad, tv_eff, nv, budget, out_buffers, out_bytes)
        if tm_eff < 64 and M >= 64:
            # Resident f32 output is the limiter (huge V on v7x): single-buffer
            # it to halve the dominant 2*tm*V*4 VMEM term and regain tm.
            out_buffers = 1
            tm_eff = _pick_tm(M, D, V_pad, tv_eff, nv, budget, out_buffers,
                              out_bytes)
    else:
        tm_eff = min(tm, _round_up(M, 8))
    tm_eff = max(8, tm_eff // 8 * 8)

    M_pad = _round_up(M, tm_eff)
    if M_pad != M:
        x2d = jnp.pad(x2d, ((0, M_pad - M), (0, 0)))   # padded rows sliced off

    if out_buffers == 1:
        try:
            out_spec = pl.BlockSpec((tm_eff, V_pad), lambda i, j: (i, 0),
                                    pipeline_mode=pl.Buffered(1))
        except TypeError:  # BlockSpec without pipeline_mode support
            out_spec = pl.BlockSpec((tm_eff, V_pad), lambda i, j: (i, 0))
            out_buffers = 2
    else:
        out_spec = pl.BlockSpec((tm_eff, V_pad), lambda i, j: (i, 0))

    # Peak VMEM: resident output, double-buffered inputs, per-step f32
    # temporaries (logits / exp), online-softmax scratch (lane-padded).
    vmem_needed = (
        out_buffers * tm_eff * V_pad * out_bytes
        + 2 * tm_eff * D * 2
        + 2 * tv_eff * D * 2
        + 4 * tm_eff * tv_eff * 4
        + (nv + 2) * _round_up(tm_eff, 8) * 128 * 4
    )
    vmem_limit = min(int(cap * 0.9), max(32 << 20, int(vmem_needed * 1.3)))

    kernel = functools.partial(
        _proj_softmax_kernel, tv=tv_eff, nv=nv,
        v_valid=None if V_pad == V else V,
    )

    out2d = pl.pallas_call(
        kernel,
        out_shape=jax.ShapeDtypeStruct((M_pad, V_pad), jnp.float32),
        grid_spec=pltpu.PrefetchScalarGridSpec(
            num_scalar_prefetch=0,
            grid=(M_pad // tm_eff, nv),
            in_specs=[
                pl.BlockSpec((tm_eff, D), lambda i, j: (i, 0)),   # resident rows
                pl.BlockSpec((tv_eff, D), lambda i, j: (j, 0)),   # streamed weight
            ],
            out_specs=out_spec,                                   # resident output
            scratch_shapes=[
                pltpu.VMEM((tm_eff, 1), jnp.float32),             # running max
                pltpu.VMEM((tm_eff, 1), jnp.float32),             # running sum
                pltpu.VMEM((nv, tm_eff, 1), jnp.float32),         # per-tile maxima
            ],
        ),
        compiler_params=pltpu.CompilerParams(
            dimension_semantics=("parallel", "arbitrary"),
            vmem_limit_bytes=vmem_limit,
        ),
    )(x2d, w)

    return out2d[:M, :V].reshape(B, S, V)


if __name__ == "__main__":
    # Small deterministic shapes consistent with the module (d_model = 512).
    batch, seq, dm, vocab_size = 2, 8, 512, 1024

    key = jax.random.PRNGKey(0)
    kx, kw = jax.random.split(key)

    # Deterministic parameter init (mimics nn.Linear default uniform bound),
    # then cast ONCE to bf16 at "parameter load" time (perf review item).
    bound = 1.0 / (dm ** 0.5)
    weight_f32 = jax.random.uniform(kw, (vocab_size, dm), dtype=jnp.float32,
                                    minval=-bound, maxval=bound)
    weight = weight_f32.astype(jnp.bfloat16)
    x = jax.random.normal(kx, (batch, seq, dm), dtype=jnp.float32)

    out = jax.block_until_ready(projection_layer(x, weight))
    # Also exercise the multi-tile online-softmax path explicitly.
    out_tiled = jax.block_until_ready(projection_layer(x, weight, tv=256))

    # Reference with the same bf16 MXU inputs / f32 accumulation + softmax.
    xb = x.reshape(batch * seq, dm).astype(jnp.bfloat16)
    ref_logits = lax.dot_general(
        xb, weight, (((1,), (1,)), ((), ())), preferred_element_type=jnp.float32)
    ref = jax.nn.softmax(ref_logits, axis=-1).reshape(batch, seq, vocab_size)

    assert out.shape == (batch, seq, vocab_size)
    assert bool(jnp.all(jnp.isfinite(out)))
    assert jnp.allclose(out, ref, atol=2e-3, rtol=2e-3)
    assert out_tiled.shape == (batch, seq, vocab_size)
    assert jnp.allclose(out_tiled, ref, atol=2e-3, rtol=2e-3)

    print("KERNEL_OK")
</pallas_src>

<mosaic_0001>
module attributes {stable_mosaic.version = 11 : i64} {
  func.func @_proj_softmax_kernel(%arg0: i32, %arg1: i32, %arg2: memref<8x512xbf16, #tpu.memory_space<vmem>>, %arg3: memref<1024x512xbf16, #tpu.memory_space<vmem>>, %arg4: memref<8x1024xf32, #tpu.memory_space<vmem>>, %arg5: memref<8x1xf32, #tpu.memory_space<vmem>>, %arg6: memref<8x1xf32, #tpu.memory_space<vmem>>, %arg7: memref<1x8x1xf32, #tpu.memory_space<vmem>>) attributes {dimension_semantics = [#tpu.dimension_semantics<parallel>, #tpu.dimension_semantics<arbitrary>], iteration_bounds = array<i64: 2, 1>, scalar_prefetch = 0 : i64, scratch_operands = 3 : i64, tpu.core_type = #tpu.core_type<tc>, window_params = [{transform_indices = @transform_0, window_bounds = array<i64: 8, 512>}, {transform_indices = @transform_1, window_bounds = array<i64: 1024, 512>}, {transform_indices = @transform_2, window_bounds = array<i64: 8, 1024>}]} {
    %c0_i32 = arith.constant 0 : i32
    %0 = arith.cmpi eq, %arg1, %c0_i32 : i32
    %1 = arith.extui %0 : i1 to i32
    %c0_i32_0 = arith.constant 0 : i32
    %2 = arith.cmpi ne, %1, %c0_i32_0 : i32
    scf.if %2 {
      %cst_20 = arith.constant 0xFF800000 : f32
      %30 = vector.broadcast %cst_20 : f32 to vector<8x1xf32>
      %c0_21 = arith.constant 0 : index
      %c0_22 = arith.constant 0 : index
      %31 = vector.load %arg5[%c0_21, %c0_22] : memref<8x1xf32, #tpu.memory_space<vmem>>, vector<8x1xf32>
      tpu.vector_store %arg5[%c0_21, %c0_22], %30 {strides = array<i32>} : memref<8x1xf32, #tpu.memory_space<vmem>>, vector<8x1xf32>,
      %cst_23 = arith.constant 0.000000e+00 : f32
      %32 = vector.broadcast %cst_23 : f32 to vector<8x1xf32>
      %c0_24 = arith.constant 0 : index
      %c0_25 = arith.constant 0 : index
      %33 = vector.load %arg6[%c0_24, %c0_25] : memref<8x1xf32, #tpu.memory_space<vmem>>, vector<8x1xf32>
      tpu.vector_store %arg6[%c0_24, %c0_25], %32 {strides = array<i32>} : memref<8x1xf32, #tpu.memory_space<vmem>>, vector<8x1xf32>,
    } else {
    }
    %c0 = arith.constant 0 : index
    %c0_1 = arith.constant 0 : index
    %3 = vector.load %arg2[%c0, %c0_1] : memref<8x512xbf16, #tpu.memory_space<vmem>>, vector<8x512xbf16>
    %c0_2 = arith.constant 0 : index
    %c0_3 = arith.constant 0 : index
    %4 = vector.load %arg3[%c0_2, %c0_3] : memref<1024x512xbf16, #tpu.memory_space<vmem>>, vector<1024x512xbf16>
    %cst = arith.constant dense<0.000000e+00> : vector<8x1024xf32>
    %5 = tpu.matmul %3, %4, %cst {dimension_numbers = #tpu.dot_dimension_numbers<[1], [1], [0], [0], [0, 0, 1, 0], [], []>} : vector<8x512xbf16>, vector<1024x512xbf16>, vector<8x1024xf32> -> vector<8x1024xf32>
    %c0_4 = arith.constant 0 : index
    %c0_5 = arith.constant 0 : index
    %6 = vector.load %arg5[%c0_4, %c0_5] : memref<8x1xf32, #tpu.memory_space<vmem>>, vector<8x1xf32>
    %cst_6 = arith.constant dense<0xFF800000> : vector<8xf32>
    %7 = vector.multi_reduction <maximumf>, %5, %cst_6 [1] : vector<8x1024xf32> to vector<8xf32>
    %8 = vector.shape_cast %7 : vector<8xf32> to vector<8x1xf32>
    %9 = arith.maximumf %6, %8 : vector<8x1xf32>
    %10 = vector.broadcast %9 : vector<8x1xf32> to vector<8x1024xf32>
    %11 = arith.subf %5, %10 : vector<8x1024xf32>
    %12 = math.exp %11 : vector<8x1024xf32>
    %c0_7 = arith.constant 0 : index
    %c0_8 = arith.constant 0 : index
    %13 = vector.load %arg6[%c0_7, %c0_8] : memref<8x1xf32, #tpu.memory_space<vmem>>, vector<8x1xf32>
    %14 = arith.subf %6, %9 : vector<8x1xf32>
    %15 = math.exp %14 : vector<8x1xf32>
    %16 = arith.mulf %13, %15 : vector<8x1xf32>
    %cst_9 = arith.constant dense<0.000000e+00> : vector<8xf32>
    %17 = vector.multi_reduction <add>, %12, %cst_9 [1] : vector<8x1024xf32> to vector<8xf32>
    %18 = vector.shape_cast %17 : vector<8xf32> to vector<8x1xf32>
    %19 = arith.addf %16, %18 : vector<8x1xf32>
    %c0_10 = arith.constant 0 : index
    %c0_11 = arith.constant 0 : index
    %20 = vector.load %arg6[%c0_10, %c0_11] : memref<8x1xf32, #tpu.memory_space<vmem>>, vector<8x1xf32>
    tpu.vector_store %arg6[%c0_10, %c0_11], %19 {strides = array<i32>} : memref<8x1xf32, #tpu.memory_space<vmem>>, vector<8x1xf32>,
    %c0_12 = arith.constant 0 : index
    %c0_13 = arith.constant 0 : index
    %21 = vector.load %arg5[%c0_12, %c0_13] : memref<8x1xf32, #tpu.memory_space<vmem>>, vector<8x1xf32>
    tpu.vector_store %arg5[%c0_12, %c0_13], %9 {strides = array<i32>} : memref<8x1xf32, #tpu.memory_space<vmem>>, vector<8x1xf32>,
    %22 = arith.index_cast %arg1 : i32 to index
    %c0_14 = arith.constant 0 : index
    %c0_15 = arith.constant 0 : index
    %23 = vector.load %arg7[%22, %c0_14, %c0_15] : memref<1x8x1xf32, #tpu.memory_space<vmem>>, vector<1x8x1xf32>
    %24 = vector.shape_cast %23 : vector<1x8x1xf32> to vector<8x1xf32>
    %25 = vector.shape_cast %9 : vector<8x1xf32> to vector<1x8x1xf32>
    tpu.vector_store %arg7[%22, %c0_14, %c0_15], %25 {strides = array<i32>} : memref<1x8x1xf32, #tpu.memory_space<vmem>>, vector<1x8x1xf32>,
    %c0_16 = arith.constant 0 : index
    %c0_17 = arith.constant 0 : index
    %26 = vector.load %arg4[%c0_16, %c0_17] : memref<8x1024xf32, #tpu.memory_space<vmem>>, vector<8x1024xf32>
    tpu.vector_store %arg4[%c0_16, %c0_17], %12 {strides = array<i32>} : memref<8x1024xf32, #tpu.memory_space<vmem>>, vector<8x1024xf32>,
    %c0_i32_18 = arith.constant 0 : i32
    %27 = arith.cmpi eq, %arg1, %c0_i32_18 : i32
    %28 = arith.extui %27 : i1 to i32
    %c0_i32_19 = arith.constant 0 : i32
    %29 = arith.cmpi ne, %28, %c0_i32_19 : i32
    scf.if %29 {
      %c0_20 = arith.constant 0 : index
      %c0_21 = arith.constant 0 : index
      %30 = vector.load %arg6[%c0_20, %c0_21] : memref<8x1xf32, #tpu.memory_space<vmem>>, vector<8x1xf32>
      %31 = tpu.reciprocal %30 {approx = true} : vector<8x1xf32> -> vector<8x1xf32>
      %c0_22 = arith.constant 0 : index
      %c0_23 = arith.constant 0 : index
      %32 = vector.load %arg5[%c0_22, %c0_23] : memref<8x1xf32, #tpu.memory_space<vmem>>, vector<8x1xf32>
      %c0_24 = arith.constant 0 : index
      %c0_25 = arith.constant 0 : index
      %c0_26 = arith.constant 0 : index
      %33 = vector.load %arg7[%c0_24, %c0_25, %c0_26] : memref<1x8x1xf32, #tpu.memory_space<vmem>>, vector<1x8x1xf32>
      %34 = vector.shape_cast %33 : vector<1x8x1xf32> to vector<8x1xf32>
      %35 = arith.subf %34, %32 : vector<8x1xf32>
      %36 = math.exp %35 : vector<8x1xf32>
      %37 = arith.mulf %36, %31 : vector<8x1xf32>
      %c0_27 = arith.constant 0 : index
      %c0_28 = arith.constant 0 : index
      %38 = vector.load %arg4[%c0_27, %c0_28] : memref<8x1024xf32, #tpu.memory_space<vmem>>, vector<8x1024xf32>
      %39 = vector.broadcast %37 : vector<8x1xf32> to vector<8x1024xf32>
      %40 = arith.mulf %38, %39 : vector<8x1024xf32>
      %c0_29 = arith.constant 0 : index
      %c0_30 = arith.constant 0 : index
      %41 = vector.load %arg4[%c0_29, %c0_30] : memref<8x1024xf32, #tpu.memory_space<vmem>>, vector<8x1024xf32>
      tpu.vector_store %arg4[%c0_29, %c0_30], %40 {strides = array<i32>} : memref<8x1024xf32, #tpu.memory_space<vmem>>, vector<8x1024xf32>,
    } else {
    }
    return
  }
  func.func @transform_0(%arg0: i32, %arg1: i32) -> (i32, i32) {
    %c0_i32 = arith.constant 0 : i32
    %c0_i32_0 = arith.constant 0 : i32
    return %arg0, %c0_i32 : i32, i32
  }
  func.func @transform_1(%arg0: i32, %arg1: i32) -> (i32, i32) {
    %c0_i32 = arith.constant 0 : i32
    %c0_i32_0 = arith.constant 0 : i32
    return %arg1, %c0_i32 : i32, i32
  }
  func.func @transform_2(%arg0: i32, %arg1: i32) -> (i32, i32) {
    %c0_i32 = arith.constant 0 : i32
    %c0_i32_0 = arith.constant 0 : i32
    return %arg0, %c0_i32 : i32, i32
  }
}

</mosaic_0001>

<bundles_post_ra>
// kernel: tpu_custom_call.1
= control target key start
LH: loop header
LB: loop body
LE: loop exit
PB: predicated region body
PF: predicated region fallthrough
CT: control target
= control target key end

     0   :  { %7 = vsyncpa [#allocation6], 0  ;;  %s3473_s0 = inlined_call_operand.hbm [shape: bf16[16,512], index: 0, kind: input, shape index: {}]   ;;  %s3474_s1 = inlined_call_operand.hbm [shape: bf16[1024,512], index: 1, kind: input, shape index: {}]   ;;  %s3475_s2 = inlined_call_operand.hbm [shape: f32[16,1024], index: 2, kind: output, shape index: {}]  }
   0x1   :  { %9 = vsyncpa [#allocation6 + $0x1], 0 }
   0x2   :  { %10 = vsyncpa [#allocation9], 0 }
   0x3   :  { %11 = vsyncpa [#allocation7], 0 }
   0x4   :  { %13 = vsyncpa [#allocation7 + $0x1], 0  ;;  %s3232_s9 = smov 0   ;;  %s3234_s10 = smov 0  }
   0x5   :  { %s3236_s11 = smov 0   ;;  %s3238_s12 = smov 0  }
   0x6   :  { %s3240_s13 = smov 0   ;;  %s3242_s14 = smov 0  }
   0x7 LB: > { %s2300_s15 = sadd.s32 4294967295, %s3207_s14   ;;  %s2301_s16 = sadd.s32 4294967294, %s3207_s14   ;;  %s3207_s14 = sphi %s3242_s14, %s19_s14   ;;  %s3203_s13 = sphi %s3240_s13, %s3493_s13   ;;  %s3199_s12 = sphi %s3238_s12, %s3492_s12   ;;  %s3195_s11 = sphi %s3236_s11, %s3491_s11   ;;  %s3191_s10 = sphi %s3234_s10, %s3490_s10   ;;  %s3187_s9 = sphi %s3232_s9, %s3489_s9  }
   0x8   : > { %p51_p0 = scmp.ne.s32.totalorder %s3191_s10, %s3187_s9  ;;  %p3266_p1 = scmp.eq.s32.totalorder %s2300_s15, 0 }
   0x9   : > { %p3270_p2 = scmp.eq.s32.totalorder %s2300_s15, 1  ;;  %p107_p3 = scmp.eq.s32.totalorder %s2301_s16, 1 }
   0xa   : > { %p3276_p4 = por %p3266_p1, %p51_p0  ;;  %p2302_p5 = scmp.ge.s32.totalorder %s3207_s14, 1 }
   0xb   : > { %p3281_p6 = por %p107_p3, %p51_p0  ;;  %p114_p7 = scmp.lt.s32.totalorder %s3207_s14, 3 }
   0xc   : > { %s3479_s19 = scalar_select %p3276_p4, 1, 0 }
   0xd   : > { %s3480_s20 = scalar_select %p3281_p6, 1, 0 }
   0xe   : > { %p3286_p8 = pnand %p2302_p5, %p114_p7  ;;  %s3209_s22 = smov [#allocation8]  }
   0xf   : > { %s130_s23 = sshll.u32 %s3209_s22, 4  ;;  %s31_s25 = sadd.s32 1, %s3203_s13  ;;  %s131_s23 = int_to_ptr.vmem [resolvable:$true] %s130_s23 }
  0x10   : > { %p2587_p9 = pneg %p3286_p8  ;;  %s3080_s26 = scalar_lea.vmem %s131_s23, 32768 }
  0x11   : > { %p3081_p13 = scmp.ne.s32.totalorder %s131_s23, %s3080_s26  ;;  %p3088_p5 = scmp.lt.s32.totalorder %s131_s23, %s131_s23 }
  0x12   : > { %p3295_p11 = pnand %p2587_p9, %p3266_p1  ;;  %p3089_p7 = scmp.lt.s32.totalorder %s3080_s26, %s3080_s26 }
  0x14   : > { %p3071_p12 = pneg %p3295_p11  ;;  %p3090_p6 = por %p3089_p7, %p3088_p5 }
  0x16   : > { %p3083_p0 = pnand %p3081_p13, %p3071_p12 }
  0x18   : > { %p3084_p3 = pneg %p3083_p0 }
  0x1a   : > { %p3091_p4 = pnand %p3090_p6, %p3084_p3 }
  0x1c   : > { %3094 = shalt.err (!%p3091_p4)
}
  0x1d   : > { %s3210_s27 = smov 256   ;;  %s3211_s28 = smov 16  }
  0x1e   : > { %2590 = dma.hbm_to_vmem [thread:$0]  (!%p3295_p11), %s3474_s1, 32768, %s131_s23, [#allocation9], %s3210_s27, %s3210_s27, %s3211_s28  }
  0x1f   : > { %p33_p6 = scmp.ge.s32.totalorder %s31_s25, 2  ;;  %s38_s3 = sadd.s32 1, %s3195_s11 }
  0x20   : > { %p45_p4 = scmp.ne.s32.totalorder %s3195_s11, %s3191_s10  ;;  %p46_p9 = scmp.eq.s32.totalorder %s3207_s14, 0 }
  0x21   : > { %s3495_s25 = smov (%p33_p6, %s31_s25), 0  ;;  %p2600_p0 = scmp.lt.s32.totalorder %s3207_s14, 2 }
  0x22   : > { %p3313_p12 = por %p46_p9, %p45_p4  ;;  %p3319_p13 = por %p3270_p2, %p45_p4 }
  0x23   : > { %s35_s6 = ssub.s32 %s3203_s13, %s3495_s25  ;;  %s144_s7 = sand.u32 1, %s3195_s11  }
  0x24   : > { %p36_p11 = scmp.eq.s32.totalorder %s35_s6, 0  ;;  %s2305_s8 = sshll.u32 %s144_s7, 4 }
  0x25   : > { %s2577_s16 = sshll.u32 %s3203_s13, 8  ;;  %s148_s26 = scalar_lea.vmem [#allocation5], %s2305_s8 }
  0x26   : > { %s3328_s15 = scalar_select %p36_p11, %s3195_s11, %s38_s3  }
  0x27   : > { %s154_s24 = scalar_lea.hbm %s3473_s0, %s2577_s16  ;;  %s156_s27 = sshll.u32 %s148_s26, 4  ;;  %s157_s27 = int_to_ptr.vmem [resolvable:$true] %s156_s27 }
  0x28   : > { %p3336_p2 = pnand %p2600_p0, %p3313_p12  ;;  %s145_s28 = scalar_lea.sflag [#allocation6], %s144_s7 }
  0x29   : > { %s3108_s29 = scalar_lea.vmem %s157_s27, 256  ;;  %s3212_s30 = smov [#allocation5]  }
  0x2a   : > { %p3097_p3 = pneg %p3336_p2  ;;  %p3109_p5 = scmp.ne.s32.totalorder %s157_s27, %s3108_s29 }
  0x2b   : > { %s3113_s3 = sshll.u32 %s3212_s30, 4  ;;  %s3114_s3 = int_to_ptr.vmem [resolvable:$false] %s3113_s3 }
  0x2c   : > { %p3111_p7 = pnand %p3109_p5, %p3097_p3  ;;  %s3115_s6 = scalar_lea.vmem %s3114_s3, 512 }
  0x2d   : > { %p3116_p4 = scmp.lt.s32.totalorder %s157_s27, %s3114_s3  ;;  %p3117_p9 = scmp.lt.s32.totalorder %s3115_s6, %s3108_s29 }
  0x2e   : > { %p3112_p6 = pneg %p3111_p7 }
  0x2f   : > { %p3118_p11 = por %p3117_p9, %p3116_p4 }
  0x31   : > { %p3119_p10 = pnand %p3118_p11, %p3112_p6 }
  0x33   : > { %3122 = shalt.err (!%p3119_p10)
}
  0x34   : > { %2594 = dma.hbm_to_vmem [thread:$0]  (!%p3336_p2), %s154_s24, 256, %s157_s27, %s145_s28  }
  0x35   : > { %165 = sbr.rel (%p3286_p8) target bundleno = 1380 (0x564), region = 28  ;;  %s3347_s4 = sand.u32 (!%p3286_p8), 1, %s3191_s10  }
  0x36   : > { %s2309_s7 = sshll.u32 (!%p3286_p8), %s3347_s4, 4  ;;  %s168_s8 = scalar_lea.sflag (!%p3286_p8), [#allocation6], %s3347_s4 }
  0x37   : > { %s3351_s16 = scalar_lea.vmem (!%p3286_p8), [#allocation5], %s2309_s7  ;;  %p3486_p12 = scmp.ne.s32.totalorder (!%p3286_p8), %s3479_s19, 0 }
  0x3a   : > { %3174 = dma.done.wait (%p3486_p12), %s168_s8, 256  }
  0x3b   : > { %3176 = vsyncadd (%p3486_p12), %s168_s8, 4294967040 }
  0x3c   : > { %3178 = dma.done.wait (%p3266_p1), [#allocation9], 32768  }
  0x3d   : > { %3180 = vsyncadd (%p3266_p1), [#allocation9], 4294934528  ;;  %v2659_v0 = vld [vmem:[#allocation8 + $0xe4] ss:$16 sps:$4 sm:$0xff]   ;;  %v2661_v1 = vld [vmem:[#allocation8 + $0xec] ss:$16 sps:$4 sm:$0xff]  }
  0x3e   : > { %1756 = vmatprep.subr.bf16.mxu0 %v2659_v0  ;;  %v2663_v2 = vld [vmem:[#allocation8 + $0xe0] ss:$16 sps:$4 sm:$0xff]   ;;  %v2664_v3 = vld [vmem:[#allocation8 + $0xe8] ss:$16 sps:$4 sm:$0xff]   ;;  %1797 = vmatprep.subr.bf16.mxu1 %v2661_v1  ;;  %v2665_v4 = vld [vmem:[#allocation8 + $0xc4] ss:$16 sps:$4 sm:$0xff]  }
  0x3f   : > { %1757 = vmatpush1.bf16.xpose.msra.mxu0 %v2663_v2  ;;  %1798 = vmatpush1.bf16.xpose.msra.mxu1 %v2664_v3  ;;  %v2667_v5 = vld [vmem:[#allocation8 + $0xcc] ss:$16 sps:$4 sm:$0xff]   ;;  %v2669_v6 = vld [vmem:[#allocation8 + $0xc0] ss:$16 sps:$4 sm:$0xff]   ;;  %v2670_v7 = vld [vmem:[#allocation8 + $0xc8] ss:$16 sps:$4 sm:$0xff]  }
  0x40   : > { %1758 = vmatprep.subr.bf16.mxu0 %v2665_v4  ;;  %1799 = vmatprep.subr.bf16.mxu1 %v2667_v5  ;;  %v2671_v8 = vld [vmem:[#allocation8 + $0xa4] ss:$16 sps:$4 sm:$0xff]   ;;  %v2673_v9 = vld [vmem:[#allocation8 + $0xac] ss:$16 sps:$4 sm:$0xff]   ;;  %v2675_v10 = vld [vmem:[#allocation8 + $0xa0] ss:$16 sps:$4 sm:$0xff]  }
  0x41   : > { %v2676_v11 = vld [vmem:[#allocation8 + $0xa8] ss:$16 sps:$4 sm:$0xff]   ;;  %v2677_v12 = vld [vmem:[#allocation8 + $0x84] ss:$16 sps:$4 sm:$0xff]   ;;  %v2679_v13 = vld [vmem:[#allocation8 + $0x8c] ss:$16 sps:$4 sm:$0xff]  }
  0x42   : > { %v2681_v14 = vld [vmem:[#allocation8 + $0x80] ss:$16 sps:$4 sm:$0xff]   ;;  %v2682_v15 = vld [vmem:[#allocation8 + $0x88] ss:$16 sps:$4 sm:$0xff]   ;;  %v2683_v16 = vld [vmem:[#allocation8 + $0x64] ss:$16 sps:$4 sm:$0xff]  }
  0x43   : > { %v2685_v17 = vld [vmem:[#allocation8 + $0x6c] ss:$16 sps:$4 sm:$0xff]   ;;  %v2687_v18 = vld [vmem:[#allocation8 + $0x60] ss:$16 sps:$4 sm:$0xff]   ;;  %v2688_v19 = vld [vmem:[#allocation8 + $0x68] ss:$16 sps:$4 sm:$0xff]  }
  0x44   : > { %v2689_v20 = vld [vmem:[#allocation8 + $0x44] ss:$16 sps:$4 sm:$0xff]   ;;  %v2691_v21 = vld [vmem:[#allocation8 + $0x4c] ss:$16 sps:$4 sm:$0xff]   ;;  %v2693_v22 = vld [vmem:[#allocation8 + $0x40] ss:$16 sps:$4 sm:$0xff]  }
  0x45   : > { %v2694_v23 = vld [vmem:[#allocation8 + $0x48] ss:$16 sps:$4 sm:$0xff]   ;;  %v2695_v24 = vld [vmem:[#allocation8 + $0x24] ss:$16 sps:$4 sm:$0xff]   ;;  %v2697_v25 = vld [vmem:[#allocation8 + $0x2c] ss:$16 sps:$4 sm:$0xff]  }
  0x46   : > { %v3362_v26 = vld [vmem:[%s3351_s16] sm:$0xff]  ;;  %v3369_v28 = vld [vmem:[%s3351_s16 + $0x8] sm:$0xff]  ;;  %vm201_vm0 = vcmask 7168   ;;  %s2311_s17 = sshll.u32 %s3347_s4, 6  ;;  %s2578_s19 = sshll.u32 %s3199_s12, 10 }
  0x47   : > { %1759 = vmatpush1.bf16.xpose.msra.mxu0 %v2669_v6  ;;  %1800 = vmatpush1.bf16.xpose.msra.mxu1 %v2670_v7  ;;  %v3366_v27 = vcombine.high %v3362_v26, %v3362_v26  ;;  %v3373_v29 = vcombine.high %v3369_v28, %v3369_v28  ;;  %v2699_v30 = vld [vmem:[#allocation8 + $0x20] ss:$16 sps:$4 sm:$0xff]   ;;  %v2700_v31 = vld [vmem:[#allocation8 + $0x28] ss:$16 sps:$4 sm:$0xff]   ;;  %v2701_v32 = vld [vmem:[#allocation8 + $0x4] ss:$16 sps:$4 sm:$0xff]   ;;  %v3379_v7 = vcombine.low %v3362_v26, %v3362_v26  ;;  %s3425_s26 = scalar_lea.hbm %s3475_s2, %s2578_s19 }
  0x48   : > { %1760 = vmatprep.subr.bf16.mxu0 %v2671_v8  ;;  %1801 = vmatprep.subr.bf16.mxu1 %v2673_v9  ;;  %v2703_v33 = vld [vmem:[#allocation8 + $0xc] ss:$16 sps:$4 sm:$0xff]   ;;  %v2705_v34 = vld [vmem:[#allocation8] ss:$16 sps:$4 sm:$0xff]   ;;  %v2706_v35 = vld [vmem:[#allocation8 + $0x8] ss:$16 sps:$4 sm:$0xff]   ;;  %v3383_v8 = vcombine.low %v3369_v28, %v3369_v28 }
  0x49   : > { %1788 = vmatprep.mubr.bf16.mxu0 %v3366_v27  ;;  %1829 = vmatprep.mubr.bf16.mxu1 %v3373_v29  ;;  %v2707_v36 = vld [vmem:[#allocation8 + $0x1e4] ss:$16 sps:$4 sm:$0xff]   ;;  %v2709_v37 = vld [vmem:[#allocation8 + $0x1ec] ss:$16 sps:$4 sm:$0xff]   ;;  %v2711_v38 = vld [vmem:[#allocation8 + $0x1e0] ss:$16 sps:$4 sm:$0xff]  }
  0x4a   : > { %v2712_v39 = vld [vmem:[#allocation8 + $0x1e8] ss:$16 sps:$4 sm:$0xff]   ;;  %v2713_v40 = vld [vmem:[#allocation8 + $0x1c4] ss:$16 sps:$4 sm:$0xff]   ;;  %v2715_v41 = vld [vmem:[#allocation8 + $0x1cc] ss:$16 sps:$4 sm:$0xff]  }
  0x4b   : > { %v2717_v42 = vld [vmem:[#allocation8 + $0x1c0] ss:$16 sps:$4 sm:$0xff]   ;;  %v2718_v43 = vld [vmem:[#allocation8 + $0x1c8] ss:$16 sps:$4 sm:$0xff]   ;;  %v2719_v44 = vld [vmem:[#allocation8 + $0x1a4] ss:$16 sps:$4 sm:$0xff]  }
  0x4c   : > { %v2721_v45 = vld [vmem:[#allocation8 + $0x1ac] ss:$16 sps:$4 sm:$0xff]   ;;  %v2723_v46 = vld [vmem:[#allocation8 + $0x1a0] ss:$16 sps:$4 sm:$0xff]   ;;  %v2724_v47 = vld [vmem:[#allocation8 + $0x1a8] ss:$16 sps:$4 sm:$0xff]  }
  0x4d   : > { %v2725_v48 = vld [vmem:[#allocation8 + $0x184] ss:$16 sps:$4 sm:$0xff]   ;;  %v2727_v49 = vld [vmem:[#allocation8 + $0x18c] ss:$16 sps:$4 sm:$0xff]   ;;  %v2729_v50 = vld [vmem:[#allocation8 + $0x180] ss:$16 sps:$4 sm:$0xff]  }
  0x4e   : > { %v2730_v51 = vld [vmem:[#allocation8 + $0x188] ss:$16 sps:$4 sm:$0xff]   ;;  %v2731_v52 = vld [vmem:[#allocation8 + $0x164] ss:$16 sps:$4 sm:$0xff]   ;;  %v2733_v53 = vld [vmem:[#allocation8 + $0x16c] ss:$16 sps:$4 sm:$0xff]  }
  0x4f   : > { %1761 = vmatpush1.bf16.xpose.msra.mxu0 %v2675_v10  ;;  %1802 = vmatpush1.bf16.xpose.msra.mxu1 %v2676_v11  ;;  %v2735_v54 = vld [vmem:[#allocation8 + $0x160] ss:$16 sps:$4 sm:$0xff]   ;;  %v2736_v55 = vld [vmem:[#allocation8 + $0x168] ss:$16 sps:$4 sm:$0xff]   ;;  %v2737_v56 = vld [vmem:[#allocation8 + $0x144] ss:$16 sps:$4 sm:$0xff]  }
  0x50   : > { %1762 = vmatprep.subr.bf16.mxu0 %v2677_v12  ;;  %1803 = vmatprep.subr.bf16.mxu1 %v2679_v13  ;;  %v2739_v57 = vld [vmem:[#allocation8 + $0x14c] ss:$16 sps:$4 sm:$0xff]   ;;  %v2741_v58 = vld [vmem:[#allocation8 + $0x140] ss:$16 sps:$4 sm:$0xff]   ;;  %v2742_v59 = vld [vmem:[#allocation8 + $0x148] ss:$16 sps:$4 sm:$0xff]  }
  0x51   : > { %v2743_v60 = vld [vmem:[#allocation8 + $0x124] ss:$16 sps:$4 sm:$0xff]   ;;  %v2745_v61 = vld [vmem:[#allocation8 + $0x12c] ss:$16 sps:$4 sm:$0xff]   ;;  %v2747_v62 = vld [vmem:[#allocation8 + $0x120] ss:$16 sps:$4 sm:$0xff]  }
  0x52   : > { %v2748_v63 = vld [vmem:[#allocation8 + $0x128] ss:$16 sps:$4 sm:$0xff]   ;;  %v2749_v0 = vld [vmem:[#allocation8 + $0x104] ss:$16 sps:$4 sm:$0xff]   ;;  %v2751_v1 = vld [vmem:[#allocation8 + $0x10c] ss:$16 sps:$4 sm:$0xff]  }
  0x53   : > { %v2753_v2 = vld [vmem:[#allocation8 + $0x100] ss:$16 sps:$4 sm:$0xff]   ;;  %v2754_v3 = vld [vmem:[#allocation8 + $0x108] ss:$16 sps:$4 sm:$0xff]   ;;  %v2761_v4 = vld [vmem:[#allocation8 + $0x2e4] ss:$16 sps:$4 sm:$0xff]  }
  0x54   : > { %v2764_v5 = vld [vmem:[#allocation8 + $0x2ec] ss:$16 sps:$4 sm:$0xff]   ;;  %v2759_v6 = vld [vmem:[#allocation8 + $0x2e0] ss:$16 sps:$4 sm:$0xff]   ;;  %v2762_v9 = vld [vmem:[#allocation8 + $0x2e8] ss:$16 sps:$4 sm:$0xff]  }
  0x55   : > { %v2767_v10 = vld [vmem:[#allocation8 + $0x2c4] ss:$16 sps:$4 sm:$0xff]   ;;  %v2770_v11 = vld [vmem:[#allocation8 + $0x2cc] ss:$16 sps:$4 sm:$0xff]   ;;  %v2765_v12 = vld [vmem:[#allocation8 + $0x2c0] ss:$16 sps:$4 sm:$0xff]  }
  0x56   : > { %v2768_v13 = vld [vmem:[#allocation8 + $0x2c8] ss:$16 sps:$4 sm:$0xff]   ;;  %v2791_v26 = vld [vmem:[#allocation8 + $0x244] ss:$16 sps:$4 sm:$0xff]   ;;  %v2794_v28 = vld [vmem:[#allocation8 + $0x24c] ss:$16 sps:$4 sm:$0xff]  }
  0x57   : > { %1763 = vmatpush1.bf16.xpose.msra.mxu0 %v2681_v14  ;;  %1804 = vmatpush1.bf16.xpose.msra.mxu1 %v2682_v15  ;;  %v2773_v14 = vld [vmem:[#allocation8 + $0x2a4] ss:$16 sps:$4 sm:$0xff]   ;;  %v2776_v15 = vld [vmem:[#allocation8 + $0x2ac] ss:$16 sps:$4 sm:$0xff]   ;;  %s195_s21 = scalar_lea.vmem [#allocation10], %s2311_s17  ;;  %s2194_s12 = scalar_lea.sflag [#allocation7], %s3347_s4 }
  0x58   : > { %1764 = vmatprep.subr.bf16.mxu0 %v2683_v16  ;;  %1805 = vmatprep.subr.bf16.mxu1 %v2685_v17  ;;  %v2771_v16 = vld [vmem:[#allocation8 + $0x2a0] ss:$16 sps:$4 sm:$0xff]   ;;  %v2774_v17 = vld [vmem:[#allocation8 + $0x2a8] ss:$16 sps:$4 sm:$0xff]   ;;  %s2208_s22 = sshll.u32 %s195_s21, 4  ;;  %s3216_s18 = smov [#allocation10]   ;;  %s3427_s22 = int_to_ptr.vmem [resolvable:$true] %s2208_s22 }
  0x59   : > { %s3123_s27 = scalar_lea.vmem %s3427_s22, 1024  ;;  %s3127_s28 = sshll.u32 %s3216_s18, 4  ;;  %s3128_s28 = int_to_ptr.vmem [resolvable:$false] %s3127_s28 }
  0x5a   : > { %p3124_p1 = scmp.ne.s32.totalorder %s3427_s22, %s3123_s27  ;;  %s3129_s29 = scalar_lea.vmem %s3128_s28, 2048 }
  0x5b   : > { %p3130_p0 = scmp.lt.s32.totalorder %s3427_s22, %s3128_s28  ;;  %p3131_p2 = scmp.lt.s32.totalorder %s3129_s29, %s3123_s27 }
  0x5c   : > { %p3125_p8 = pnand %p3124_p1, %p3319_p13 }
  0x5d   : > { %p3132_p3 = por %p3131_p2, %p3130_p0 }
  0x5e   : > { %p3126_p10 = pneg %p3125_p8 }
  0x5f   : > { %1765 = vmatpush1.bf16.xpose.msra.mxu0 %v2687_v18  ;;  %1806 = vmatpush1.bf16.xpose.msra.mxu1 %v2688_v19  ;;  %v2779_v18 = vld [vmem:[#allocation8 + $0x284] ss:$16 sps:$4 sm:$0xff]   ;;  %v2782_v19 = vld [vmem:[#allocation8 + $0x28c] ss:$16 sps:$4 sm:$0xff]  }
  0x60   : > { %1766 = vmatprep.subr.bf16.mxu0 %v2689_v20  ;;  %1807 = vmatprep.subr.bf16.mxu1 %v2691_v21  ;;  %v2777_v20 = vld [vmem:[#allocation8 + $0x280] ss:$16 sps:$4 sm:$0xff]   ;;  %v2780_v21 = vld [vmem:[#allocation8 + $0x288] ss:$16 sps:$4 sm:$0xff]   ;;  %p3133_p5 = pnand %p3132_p3, %p3126_p10 }
  0x67   : > { %1767 = vmatpush1.bf16.xpose.msra.mxu0 %v2693_v22  ;;  %1808 = vmatpush1.bf16.xpose.msra.mxu1 %v2694_v23  ;;  %v2785_v22 = vld [vmem:[#allocation8 + $0x264] ss:$16 sps:$4 sm:$0xff]   ;;  %v2788_v23 = vld [vmem:[#allocation8 + $0x26c] ss:$16 sps:$4 sm:$0xff]  }
  0x68   : > { %1768 = vmatprep.subr.bf16.mxu0 %v2695_v24  ;;  %1809 = vmatprep.subr.bf16.mxu1 %v2697_v25  ;;  %v2783_v24 = vld [vmem:[#allocation8 + $0x260] ss:$16 sps:$4 sm:$0xff]   ;;  %v2786_v25 = vld [vmem:[#allocation8 + $0x268] ss:$16 sps:$4 sm:$0xff]  }
  0x6f   : > { %1769 = vmatpush1.bf16.xpose.msra.mxu0 %v2699_v30  ;;  %1810 = vmatpush1.bf16.xpose.msra.mxu1 %v2700_v31  ;;  %v2789_v30 = vld [vmem:[#allocation8 + $0x240] ss:$16 sps:$4 sm:$0xff]   ;;  %v2792_v31 = vld [vmem:[#allocation8 + $0x248] ss:$16 sps:$4 sm:$0xff]  }
  0x70   : > { %1770 = vmatprep.subr.bf16.mxu0 %v2701_v32  ;;  %1811 = vmatprep.subr.bf16.mxu1 %v2703_v33  ;;  %v2797_v32 = vld [vmem:[#allocation8 + $0x224] ss:$16 sps:$4 sm:$0xff]   ;;  %v2800_v33 = vld [vmem:[#allocation8 + $0x22c] ss:$16 sps:$4 sm:$0xff]  }
  0x77   : > { %1771 = vmatpush1.bf16.xpose.msra.mxu0 %v2705_v34  ;;  %1812 = vmatpush1.bf16.xpose.msra.mxu1 %v2706_v35  ;;  %v2795_v34 = vld [vmem:[#allocation8 + $0x220] ss:$16 sps:$4 sm:$0xff]   ;;  %v2798_v35 = vld [vmem:[#allocation8 + $0x228] ss:$16 sps:$4 sm:$0xff]  }
  0x78   : > { %1772 = vmatprep.subr.bf16.mxu0 %v2707_v36  ;;  %1813 = vmatprep.subr.bf16.mxu1 %v2709_v37  ;;  %v2803_v36 = vld [vmem:[#allocation8 + $0x204] ss:$16 sps:$4 sm:$0xff]   ;;  %v2806_v37 = vld [vmem:[#allocation8 + $0x20c] ss:$16 sps:$4 sm:$0xff]  }
  0x7f   : > { %1773 = vmatpush2.bf16.xpose.msra.mxu0 %v2711_v38  ;;  %1814 = vmatpush2.bf16.xpose.msra.mxu1 %v2712_v39  ;;  %v2801_v38 = vld [vmem:[#allocation8 + $0x200] ss:$16 sps:$4 sm:$0xff]   ;;  %v2804_v39 = vld [vmem:[#allocation8 + $0x208] ss:$16 sps:$4 sm:$0xff]  }
  0x80   : > { %1774 = vmatprep.subr.bf16.mxu0 %v2713_v40  ;;  %1815 = vmatprep.subr.bf16.mxu1 %v2715_v41  ;;  %v2809_v40 = vld [vmem:[#allocation8 + $0x3e4] ss:$16 sps:$4 sm:$0xff]   ;;  %v2812_v41 = vld [vmem:[#allocation8 + $0x3ec] ss:$16 sps:$4 sm:$0xff]  }
  0x87   : > { %1775 = vmatpush2.bf16.xpose.msra.mxu0 %v2717_v42  ;;  %1816 = vmatpush2.bf16.xpose.msra.mxu1 %v2718_v43  ;;  %v2807_v42 = vld [vmem:[#allocation8 + $0x3e0] ss:$16 sps:$4 sm:$0xff]   ;;  %v2810_v43 = vld [vmem:[#allocation8 + $0x3e8] ss:$16 sps:$4 sm:$0xff]  }
  0x88   : > { %1776 = vmatprep.subr.bf16.mxu0 %v2719_v44  ;;  %1817 = vmatprep.subr.bf16.mxu1 %v2721_v45  ;;  %v2815_v44 = vld [vmem:[#allocation8 + $0x3c4] ss:$16 sps:$4 sm:$0xff]   ;;  %v2818_v45 = vld [vmem:[#allocation8 + $0x3cc] ss:$16 sps:$4 sm:$0xff]  }
  0x8f   : > { %1777 = vmatpush2.bf16.xpose.msra.mxu0 %v2723_v46  ;;  %1818 = vmatpush2.bf16.xpose.msra.mxu1 %v2724_v47  ;;  %v2813_v46 = vld [vmem:[#allocation8 + $0x3c0] ss:$16 sps:$4 sm:$0xff]   ;;  %v2816_v47 = vld [vmem:[#allocation8 + $0x3c8] ss:$16 sps:$4 sm:$0xff]  }
  0x90   : > { %1778 = vmatprep.subr.bf16.mxu0 %v2725_v48  ;;  %1819 = vmatprep.subr.bf16.mxu1 %v2727_v49  ;;  %v2821_v48 = vld [vmem:[#allocation8 + $0x3a4] ss:$16 sps:$4 sm:$0xff]   ;;  %v2824_v49 = vld [vmem:[#allocation8 + $0x3ac] ss:$16 sps:$4 sm:$0xff]  }
  0x97   : > { %1779 = vmatpush2.bf16.xpose.msra.mxu0 %v2729_v50  ;;  %1820 = vmatpush2.bf16.xpose.msra.mxu1 %v2730_v51  ;;  %v2819_v50 = vld [vmem:[#allocation8 + $0x3a0] ss:$16 sps:$4 sm:$0xff]   ;;  %v2822_v51 = vld [vmem:[#allocation8 + $0x3a8] ss:$16 sps:$4 sm:$0xff]  }
  0x98   : > { %1780 = vmatprep.subr.bf16.mxu0 %v2731_v52  ;;  %1821 = vmatprep.subr.bf16.mxu1 %v2733_v53  ;;  %v2827_v52 = vld [vmem:[#allocation8 + $0x384] ss:$16 sps:$4 sm:$0xff]   ;;  %v2830_v53 = vld [vmem:[#allocation8 + $0x38c] ss:$16 sps:$4 sm:$0xff]  }
  0x9f   : > { %1781 = vmatpush2.bf16.xpose.msra.mxu0 %v2735_v54  ;;  %1822 = vmatpush2.bf16.xpose.msra.mxu1 %v2736_v55  ;;  %v2825_v54 = vld [vmem:[#allocation8 + $0x380] ss:$16 sps:$4 sm:$0xff]   ;;  %v2828_v55 = vld [vmem:[#allocation8 + $0x388] ss:$16 sps:$4 sm:$0xff]  }
  0xa0   : > { %1782 = vmatprep.subr.bf16.mxu0 %v2737_v56  ;;  %1823 = vmatprep.subr.bf16.mxu1 %v2739_v57  ;;  %v2833_v56 = vld [vmem:[#allocation8 + $0x364] ss:$16 sps:$4 sm:$0xff]   ;;  %v2836_v57 = vld [vmem:[#allocation8 + $0x36c] ss:$16 sps:$4 sm:$0xff]  }
  0xa7   : > { %1783 = vmatpush2.bf16.xpose.msra.mxu0 %v2741_v58  ;;  %1824 = vmatpush2.bf16.xpose.msra.mxu1 %v2742_v59  ;;  %v2831_v58 = vld [vmem:[#allocation8 + $0x360] ss:$16 sps:$4 sm:$0xff]   ;;  %v2834_v59 = vld [vmem:[#allocation8 + $0x368] ss:$16 sps:$4 sm:$0xff]  }
  0xa8   : > { %1784 = vmatprep.subr.bf16.mxu0 %v2743_v60  ;;  %1825 = vmatprep.subr.bf16.mxu1 %v2745_v61  ;;  %v2839_v60 = vld [vmem:[#allocation8 + $0x344] ss:$16 sps:$4 sm:$0xff]   ;;  %v2842_v61 = vld [vmem:[#allocation8 + $0x34c] ss:$16 sps:$4 sm:$0xff]  }
  0xaf   : > { %1785 = vmatpush2.bf16.xpose.msra.mxu0 %v2747_v62  ;;  %1826 = vmatpush2.bf16.xpose.msra.mxu1 %v2748_v63  ;;  %v2837_v62 = vld [vmem:[#allocation8 + $0x340] ss:$16 sps:$4 sm:$0xff]   ;;  %v2840_v63 = vld [vmem:[#allocation8 + $0x348] ss:$16 sps:$4 sm:$0xff]  }
  0xb0   : > { %1786 = vmatprep.subr.bf16.mxu0 %v2749_v0  ;;  %1827 = vmatprep.subr.bf16.mxu1 %v2751_v1  ;;  %v2845_v0 = vld [vmem:[#allocation8 + $0x324] ss:$16 sps:$4 sm:$0xff]   ;;  %v2848_v1 = vld [vmem:[#allocation8 + $0x32c] ss:$16 sps:$4 sm:$0xff]  }
  0xb7   : > { %1787 = vmatpush2.bf16.xpose.msra.mxu0 %v2753_v2  ;;  %1828 = vmatpush2.bf16.xpose.msra.mxu1 %v2754_v3  ;;  %v2843_v2 = vld [vmem:[#allocation8 + $0x320] ss:$16 sps:$4 sm:$0xff]   ;;  %v2846_v3 = vld [vmem:[#allocation8 + $0x328] ss:$16 sps:$4 sm:$0xff]  }
  0xb8   : > { %1838 = vmatprep.subr.bf16.mxu0 %v2761_v4  ;;  %1879 = vmatprep.subr.bf16.mxu1 %v2764_v5  ;;  %v2851_v4 = vld [vmem:[#allocation8 + $0x304] ss:$16 sps:$4 sm:$0xff]   ;;  %v2854_v5 = vld [vmem:[#allocation8 + $0x30c] ss:$16 sps:$4 sm:$0xff]  }
  0xbe   : > { %1789 = vmatmul.mubr.bf16.vlgmr.msra.gmra.mxu0 %v3379_v7  ;;  %1830 = vmatmul.mubr.bf16.vlgmr.msra.gmra.mxu1 %v3383_v8 }
  0xbf   : > { %1839 = vmatpush1.bf16.xpose.msra.mxu0 %v2759_v6  ;;  %1880 = vmatpush1.bf16.xpose.msra.mxu1 %v2762_v9  ;;  %v2849_v6 = vld [vmem:[#allocation8 + $0x300] ss:$16 sps:$4 sm:$0xff]   ;;  %v2852_v9 = vld [vmem:[#allocation8 + $0x308] ss:$16 sps:$4 sm:$0xff]  }
  0xc0   : > { %1840 = vmatprep.subr.bf16.mxu0 %v2767_v10  ;;  %1881 = vmatprep.subr.bf16.mxu1 %v2770_v11  ;;  %v2857_v10 = vld [vmem:[#allocation8 + $0x4e4] ss:$16 sps:$4 sm:$0xff]   ;;  %v2860_v11 = vld [vmem:[#allocation8 + $0x4ec] ss:$16 sps:$4 sm:$0xff]  }
  0xc1   : > { %1870 = vmatprep.mubr.bf16.mxu0 %v3366_v27  ;;  %1911 = vmatprep.mubr.bf16.mxu1 %v3373_v29 }
  0xc7   : > { %1841 = vmatpush1.bf16.xpose.msra.mxu0 %v2765_v12  ;;  %1882 = vmatpush1.bf16.xpose.msra.mxu1 %v2768_v13  ;;  %v2855_v12 = vld [vmem:[#allocation8 + $0x4e0] ss:$16 sps:$4 sm:$0xff]   ;;  %v2858_v13 = vld [vmem:[#allocation8 + $0x4e8] ss:$16 sps:$4 sm:$0xff]  }
  0xc8   : > { %1842 = vmatprep.subr.bf16.mxu0 %v2773_v14  ;;  %1883 = vmatprep.subr.bf16.mxu1 %v2776_v15  ;;  %v2863_v14 = vld [vmem:[#allocation8 + $0x4c4] ss:$16 sps:$4 sm:$0xff]   ;;  %v2866_v15 = vld [vmem:[#allocation8 + $0x4cc] ss:$16 sps:$4 sm:$0xff]  }
  0xcf   : > { %1843 = vmatpush1.bf16.xpose.msra.mxu0 %v2771_v16  ;;  %1884 = vmatpush1.bf16.xpose.msra.mxu1 %v2774_v17  ;;  %v2861_v16 = vld [vmem:[#allocation8 + $0x4c0] ss:$16 sps:$4 sm:$0xff]   ;;  %v2864_v17 = vld [vmem:[#allocation8 + $0x4c8] ss:$16 sps:$4 sm:$0xff]  }
  0xd0   : > { %1844 = vmatprep.subr.bf16.mxu0 %v2779_v18  ;;  %1885 = vmatprep.subr.bf16.mxu1 %v2782_v19  ;;  %v2869_v18 = vld [vmem:[#allocation8 + $0x4a4] ss:$16 sps:$4 sm:$0xff]   ;;  %v2872_v19 = vld [vmem:[#allocation8 + $0x4ac] ss:$16 sps:$4 sm:$0xff]  }
  0xd7   : > { %1845 = vmatpush1.bf16.xpose.msra.mxu0 %v2777_v20  ;;  %1886 = vmatpush1.bf16.xpose.msra.mxu1 %v2780_v21  ;;  %v2867_v20 = vld [vmem:[#allocation8 + $0x4a0] ss:$16 sps:$4 sm:$0xff]   ;;  %v2870_v21 = vld [vmem:[#allocation8 + $0x4a8] ss:$16 sps:$4 sm:$0xff]  }
  0xd8   : > { %1846 = vmatprep.subr.bf16.mxu0 %v2785_v22  ;;  %1887 = vmatprep.subr.bf16.mxu1 %v2788_v23  ;;  %v2875_v22 = vld [vmem:[#allocation8 + $0x484] ss:$16 sps:$4 sm:$0xff]   ;;  %v2878_v23 = vld [vmem:[#allocation8 + $0x48c] ss:$16 sps:$4 sm:$0xff]  }
  0xdf   : > { %1847 = vmatpush1.bf16.xpose.msra.mxu0 %v2783_v24  ;;  %1888 = vmatpush1.bf16.xpose.msra.mxu1 %v2786_v25  ;;  %v2873_v24 = vld [vmem:[#allocation8 + $0x480] ss:$16 sps:$4 sm:$0xff]   ;;  %v2876_v25 = vld [vmem:[#allocation8 + $0x488] ss:$16 sps:$4 sm:$0xff]  }
  0xe0   : > { %1848 = vmatprep.subr.bf16.mxu0 %v2791_v26  ;;  %1889 = vmatprep.subr.bf16.mxu1 %v2794_v28  ;;  %v2881_v26 = vld [vmem:[#allocation8 + $0x464] ss:$16 sps:$4 sm:$0xff]   ;;  %v2884_v28 = vld [vmem:[#allocation8 + $0x46c] ss:$16 sps:$4 sm:$0xff]  }
  0xe7   : > { %1849 = vmatpush1.bf16.xpose.msra.mxu0 %v2789_v30  ;;  %1890 = vmatpush1.bf16.xpose.msra.mxu1 %v2792_v31  ;;  %v2879_v30 = vld [vmem:[#allocation8 + $0x460] ss:$16 sps:$4 sm:$0xff]   ;;  %v2882_v31 = vld [vmem:[#allocation8 + $0x468] ss:$16 sps:$4 sm:$0xff]  }
  0xe8   : > { %1850 = vmatprep.subr.bf16.mxu0 %v2797_v32  ;;  %1891 = vmatprep.subr.bf16.mxu1 %v2800_v33  ;;  %v2887_v32 = vld [vmem:[#allocation8 + $0x444] ss:$16 sps:$4 sm:$0xff]   ;;  %v2890_v33 = vld [vmem:[#allocation8 + $0x44c] ss:$16 sps:$4 sm:$0xff]  }
  0xef   : > { %1851 = vmatpush1.bf16.xpose.msra.mxu0 %v2795_v34  ;;  %1892 = vmatpush1.bf16.xpose.msra.mxu1 %v2798_v35  ;;  %v2885_v34 = vld [vmem:[#allocation8 + $0x440] ss:$16 sps:$4 sm:$0xff]   ;;  %v2888_v35 = vld [vmem:[#allocation8 + $0x448] ss:$16 sps:$4 sm:$0xff]  }
  0xf0   : > { %1852 = vmatprep.subr.bf16.mxu0 %v2803_v36  ;;  %1893 = vmatprep.subr.bf16.mxu1 %v2806_v37  ;;  %v2893_v36 = vld [vmem:[#allocation8 + $0x424] ss:$16 sps:$4 sm:$0xff]   ;;  %v2896_v37 = vld [vmem:[#allocation8 + $0x42c] ss:$16 sps:$4 sm:$0xff]  }
  0xf7   : > { %1853 = vmatpush1.bf16.xpose.msra.mxu0 %v2801_v38  ;;  %1894 = vmatpush1.bf16.xpose.msra.mxu1 %v2804_v39  ;;  %v2891_v38 = vld [vmem:[#allocation8 + $0x420] ss:$16 sps:$4 sm:$0xff]   ;;  %v2894_v39 = vld [vmem:[#allocation8 + $0x428] ss:$16 sps:$4 sm:$0xff]  }
  0xf8   : > { %1854 = vmatprep.subr.bf16.mxu0 %v2809_v40  ;;  %1895 = vmatprep.subr.bf16.mxu1 %v2812_v41  ;;  %v2899_v40 = vld [vmem:[#allocation8 + $0x404] ss:$16 sps:$4 sm:$0xff]   ;;  %v2902_v41 = vld [vmem:[#allocation8 + $0x40c] ss:$16 sps:$4 sm:$0xff]  }
  0xff   : > { %1855 = vmatpush2.bf16.xpose.msra.mxu0 %v2807_v42  ;;  %1896 = vmatpush2.bf16.xpose.msra.mxu1 %v2810_v43  ;;  %v2897_v42 = vld [vmem:[#allocation8 + $0x400] ss:$16 sps:$4 sm:$0xff]   ;;  %v2900_v43 = vld [vmem:[#allocation8 + $0x408] ss:$16 sps:$4 sm:$0xff]  }
 0x100   : > { %1856 = vmatprep.subr.bf16.mxu0 %v2815_v44  ;;  %1897 = vmatprep.subr.bf16.mxu1 %v2818_v45  ;;  %v2905_v44 = vld [vmem:[#allocation8 + $0x5e4] ss:$16 sps:$4 sm:$0xff]   ;;  %v2908_v45 = vld [vmem:[#allocation8 + $0x5ec] ss:$16 sps:$4 sm:$0xff]  }
 0x107   : > { %1857 = vmatpush2.bf16.xpose.msra.mxu0 %v2813_v46  ;;  %1898 = vmatpush2.bf16.xpose.msra.mxu1 %v2816_v47  ;;  %v2903_v46 = vld [vmem:[#allocation8 + $0x5e0] ss:$16 sps:$4 sm:$0xff]   ;;  %v2906_v47 = vld [vmem:[#allocation8 + $0x5e8] ss:$16 sps:$4 sm:$0xff]  }
 0x108   : > { %1858 = vmatprep.subr.bf16.mxu0 %v2821_v48  ;;  %1899 = vmatprep.subr.bf16.mxu1 %v2824_v49  ;;  %v2911_v48 = vld [vmem:[#allocation8 + $0x5c4] ss:$16 sps:$4 sm:$0xff]   ;;  %v2914_v49 = vld [vmem:[#allocation8 + $0x5cc] ss:$16 sps:$4 sm:$0xff]  }
 0x10f   : > { %1859 = vmatpush2.bf16.xpose.msra.mxu0 %v2819_v50  ;;  %1900 = vmatpush2.bf16.xpose.msra.mxu1 %v2822_v51 }
 0x110   : > { %1860 = vmatprep.subr.bf16.mxu0 %v2827_v52  ;;  %1901 = vmatprep.subr.bf16.mxu1 %v2830_v53 }
 0x117   : > { %1861 = vmatpush2.bf16.xpose.msra.mxu0 %v2825_v54  ;;  %1902 = vmatpush2.bf16.xpose.msra.mxu1 %v2828_v55 }
 0x118   : > { %1862 = vmatprep.subr.bf16.mxu0 %v2833_v56  ;;  %1903 = vmatprep.subr.bf16.mxu1 %v2836_v57 }
 0x11f   : > { %1863 = vmatpush2.bf16.xpose.msra.mxu0 %v2831_v58  ;;  %1904 = vmatpush2.bf16.xpose.msra.mxu1 %v2834_v59  ;;  %v2909_v58 = vld [vmem:[#allocation8 + $0x5c0] ss:$16 sps:$4 sm:$0xff]   ;;  %v2912_v59 = vld [vmem:[#allocation8 + $0x5c8] ss:$16 sps:$4 sm:$0xff]  }
 0x120   : > { %1864 = vmatprep.subr.bf16.mxu0 %v2839_v60  ;;  %1905 = vmatprep.subr.bf16.mxu1 %v2842_v61 }
 0x127   : > { %1865 = vmatpush2.bf16.xpose.msra.mxu0 %v2837_v62  ;;  %1906 = vmatpush2.bf16.xpose.msra.mxu1 %v2840_v63  ;;  %v2917_v62 = vld [vmem:[#allocation8 + $0x5a4] ss:$16 sps:$4 sm:$0xff]   ;;  %v2920_v63 = vld [vmem:[#allocation8 + $0x5ac] ss:$16 sps:$4 sm:$0xff]  }
 0x128   : > { %1866 = vmatprep.subr.bf16.mxu0 %v2845_v0  ;;  %1907 = vmatprep.subr.bf16.mxu1 %v2848_v1  ;;  %v2915_v0 = vld [vmem:[#allocation8 + $0x5a0] ss:$16 sps:$4 sm:$0xff]   ;;  %v2918_v1 = vld [vmem:[#allocation8 + $0x5a8] ss:$16 sps:$4 sm:$0xff]  }
 0x12f   : > { %1867 = vmatpush2.bf16.xpose.msra.mxu0 %v2843_v2  ;;  %1908 = vmatpush2.bf16.xpose.msra.mxu1 %v2846_v3  ;;  %v2923_v2 = vld [vmem:[#allocation8 + $0x584] ss:$16 sps:$4 sm:$0xff]   ;;  %v2926_v3 = vld [vmem:[#allocation8 + $0x58c] ss:$16 sps:$4 sm:$0xff]  }
 0x130   : > { %1868 = vmatprep.subr.bf16.mxu0 %v2851_v4  ;;  %1909 = vmatprep.subr.bf16.mxu1 %v2854_v5  ;;  %v2921_v4 = vld [vmem:[#allocation8 + $0x580] ss:$16 sps:$4 sm:$0xff]   ;;  %v2924_v5 = vld [vmem:[#allocation8 + $0x588] ss:$16 sps:$4 sm:$0xff]  }
 0x137   : > { %1869 = vmatpush2.bf16.xpose.msra.mxu0 %v2849_v6  ;;  %1910 = vmatpush2.bf16.xpose.msra.mxu1 %v2852_v9  ;;  %v2929_v6 = vld [vmem:[#allocation8 + $0x564] ss:$16 sps:$4 sm:$0xff]   ;;  %v2932_v9 = vld [vmem:[#allocation8 + $0x56c] ss:$16 sps:$4 sm:$0xff]  }
 0x138   : > { %1920 = vmatprep.subr.bf16.mxu0 %v2857_v10  ;;  %1961 = vmatprep.subr.bf16.mxu1 %v2860_v11  ;;  %v2927_v10 = vld [vmem:[#allocation8 + $0x560] ss:$16 sps:$4 sm:$0xff]   ;;  %v2930_v11 = vld [vmem:[#allocation8 + $0x568] ss:$16 sps:$4 sm:$0xff]  }
 0x13e   : > { %1871 = vmatmul.mubr.bf16.vlgmr.msra.gmra.mxu0 %v3379_v7  ;;  %1912 = vmatmul.mubr.bf16.vlgmr.msra.gmra.mxu1 %v3383_v8 }
 0x13f   : > { %1921 = vmatpush1.bf16.xpose.msra.mxu0 %v2855_v12  ;;  %1962 = vmatpush1.bf16.xpose.msra.mxu1 %v2858_v13  ;;  %v2935_v12 = vld [vmem:[#allocation8 + $0x544] ss:$16 sps:$4 sm:$0xff]   ;;  %v2938_v13 = vld [vmem:[#allocation8 + $0x54c] ss:$16 sps:$4 sm:$0xff]  }
 0x140   : > { %1922 = vmatprep.subr.bf16.mxu0 %v2863_v14  ;;  %1963 = vmatprep.subr.bf16.mxu1 %v2866_v15  ;;  %v2933_v14 = vld [vmem:[#allocation8 + $0x540] ss:$16 sps:$4 sm:$0xff]   ;;  %v2936_v15 = vld [vmem:[#allocation8 + $0x548] ss:$16 sps:$4 sm:$0xff]  }
 0x141   : > { %1952 = vmatprep.mubr.bf16.mxu0 %v3366_v27  ;;  %1993 = vmatprep.mubr.bf16.mxu1 %v3373_v29 }
 0x147   : > { %1923 = vmatpush1.bf16.xpose.msra.mxu0 %v2861_v16  ;;  %1964 = vmatpush1.bf16.xpose.msra.mxu1 %v2864_v17  ;;  %v2941_v16 = vld [vmem:[#allocation8 + $0x524] ss:$16 sps:$4 sm:$0xff]   ;;  %v2944_v17 = vld [vmem:[#allocation8 + $0x52c] ss:$16 sps:$4 sm:$0xff]  }
 0x148   : > { %1924 = vmatprep.subr.bf16.mxu0 %v2869_v18  ;;  %1965 = vmatprep.subr.bf16.mxu1 %v2872_v19  ;;  %v2939_v18 = vld [vmem:[#allocation8 + $0x520] ss:$16 sps:$4 sm:$0xff]   ;;  %v2942_v19 = vld [vmem:[#allocation8 + $0x528] ss:$16 sps:$4 sm:$0xff]  }
 0x14f   : > { %1925 = vmatpush1.bf16.xpose.msra.mxu0 %v2867_v20  ;;  %1966 = vmatpush1.bf16.xpose.msra.mxu1 %v2870_v21  ;;  %v2947_v20 = vld [vmem:[#allocation8 + $0x504] ss:$16 sps:$4 sm:$0xff]   ;;  %v2950_v21 = vld [vmem:[#allocation8 + $0x50c] ss:$16 sps:$4 sm:$0xff]  }
 0x150   : > { %1926 = vmatprep.subr.bf16.mxu0 %v2875_v22  ;;  %1967 = vmatprep.subr.bf16.mxu1 %v2878_v23  ;;  %v2945_v22 = vld [vmem:[#allocation8 + $0x500] ss:$16 sps:$4 sm:$0xff]   ;;  %v2948_v23 = vld [vmem:[#allocation8 + $0x508] ss:$16 sps:$4 sm:$0xff]  }
 0x157   : > { %1927 = vmatpush1.bf16.xpose.msra.mxu0 %v2873_v24  ;;  %1968 = vmatpush1.bf16.xpose.msra.mxu1 %v2876_v25  ;;  %v2953_v24 = vld [vmem:[#allocation8 + $0x6e4] ss:$16 sps:$4 sm:$0xff]   ;;  %v2956_v25 = vld [vmem:[#allocation8 + $0x6ec] ss:$16 sps:$4 sm:$0xff]  }
 0x158   : > { %1928 = vmatprep.subr.bf16.mxu0 %v2881_v26  ;;  %1969 = vmatprep.subr.bf16.mxu1 %v2884_v28  ;;  %v2951_v26 = vld [vmem:[#allocation8 + $0x6e0] ss:$16 sps:$4 sm:$0xff]   ;;  %v2954_v28 = vld [vmem:[#allocation8 + $0x6e8] ss:$16 sps:$4 sm:$0xff]  }
 0x15f   : > { %1929 = vmatpush1.bf16.xpose.msra.mxu0 %v2879_v30  ;;  %1970 = vmatpush1.bf16.xpose.msra.mxu1 %v2882_v31  ;;  %v2959_v30 = vld [vmem:[#allocation8 + $0x6c4] ss:$16 sps:$4 sm:$0xff]   ;;  %v2962_v31 = vld [vmem:[#allocation8 + $0x6cc] ss:$16 sps:$4 sm:$0xff]  }
 0x160   : > { %1930 = vmatprep.subr.bf16.mxu0 %v2887_v32  ;;  %1971 = vmatprep.subr.bf16.mxu1 %v2890_v33  ;;  %v2957_v32 = vld [vmem:[#allocation8 + $0x6c0] ss:$16 sps:$4 sm:$0xff]   ;;  %v2960_v33 = vld [vmem:[#allocation8 + $0x6c8] ss:$16 sps:$4 sm:$0xff]  }
 0x167   : > { %1931 = vmatpush1.bf16.xpose.msra.mxu0 %v2885_v34  ;;  %1972 = vmatpush1.bf16.xpose.msra.mxu1 %v2888_v35  ;;  %v2965_v34 = vld [vmem:[#allocation8 + $0x6a4] ss:$16 sps:$4 sm:$0xff]   ;;  %v2968_v35 = vld [vmem:[#allocation8 + $0x6ac] ss:$16 sps:$4 sm:$0xff]  }
 0x168   : > { %1932 = vmatprep.subr.bf16.mxu0 %v2893_v36  ;;  %1973 = vmatprep.subr.bf16.mxu1 %v2896_v37  ;;  %v2963_v36 = vld [vmem:[#allocation8 + $0x6a0] ss:$16 sps:$4 sm:$0xff]   ;;  %v2966_v37 = vld [vmem:[#allocation8 + $0x6a8] ss:$16 sps:$4 sm:$0xff]  }
 0x16f   : > { %1933 = vmatpush1.bf16.xpose.msra.mxu0 %v2891_v38  ;;  %1974 = vmatpush1.bf16.xpose.msra.mxu1 %v2894_v39  ;;  %v2971_v38 = vld [vmem:[#allocation8 + $0x684] ss:$16 sps:$4 sm:$0xff]   ;;  %v2974_v39 = vld [vmem:[#allocation8 + $0x68c] ss:$16 sps:$4 sm:$0xff]  }
 0x170   : > { %1934 = vmatprep.subr.bf16.mxu0 %v2899_v40  ;;  %1975 = vmatprep.subr.bf16.mxu1 %v2902_v41  ;;  %v2969_v40 = vld [vmem:[#allocation8 + $0x680] ss:$16 sps:$4 sm:$0xff]   ;;  %v2977_v41 = vld [vmem:[#allocation8 + $0x664] ss:$16 sps:$4 sm:$0xff]  }
 0x177   : > { %1935 = vmatpush1.bf16.xpose.msra.mxu0 %v2897_v42  ;;  %1976 = vmatpush1.bf16.xpose.msra.mxu1 %v2900_v43  ;;  %v2975_v42 = vld [vmem:[#allocation8 + $0x660] ss:$16 sps:$4 sm:$0xff]   ;;  %v2978_v43 = vld [vmem:[#allocation8 + $0x668] ss:$16 sps:$4 sm:$0xff]  }
 0x178   : > { %1936 = vmatprep.subr.bf16.mxu0 %v2905_v44  ;;  %1977 = vmatprep.subr.bf16.mxu1 %v2908_v45  ;;  %v2983_v44 = vld [vmem:[#allocation8 + $0x644] ss:$16 sps:$4 sm:$0xff]   ;;  %v2986_v45 = vld [vmem:[#allocation8 + $0x64c] ss:$16 sps:$4 sm:$0xff]  }
 0x17e   : > { %v1790_v50 = vpop.f32.mrf.mxu0  ;;  %v1831_v51 = vpop.f32.mrf.mxu1 }
 0x17f   : > { %v3393_v52 = vadd.f32 %v1831_v51, %v1790_v50  ;;  %1937 = vmatpush2.bf16.xpose.msra.mxu0 %v2903_v46  ;;  %1978 = vmatpush2.bf16.xpose.msra.mxu1 %v2906_v47  ;;  %v2981_v46 = vld [vmem:[#allocation8 + $0x640] ss:$16 sps:$4 sm:$0xff]   ;;  %v2984_v47 = vld [vmem:[#allocation8 + $0x648] ss:$16 sps:$4 sm:$0xff]  }
 0x180   : > { %v1792_v53 = vpop.f32.mrf.mxu0  ;;  %v1833_v54 = vpop.f32.mrf.mxu1  ;;  %1938 = vmatprep.subr.bf16.mxu0 %v2911_v48  ;;  %1979 = vmatprep.subr.bf16.mxu1 %v2914_v49  ;;  %v2989_v48 = vld [vmem:[#allocation8 + $0x624] ss:$16 sps:$4 sm:$0xff]   ;;  %v2992_v49 = vld [vmem:[#allocation8 + $0x62c] ss:$16 sps:$4 sm:$0xff]   ;;  %v2987_v50 = vld [vmem:[#allocation8 + $0x620] ss:$16 sps:$4 sm:$0xff]  }
 0x181   : > { %v3395_v55 = vadd.f32 %v1833_v54, %v1792_v53  ;;  %v2990_v51 = vld [vmem:[#allocation8 + $0x628] ss:$16 sps:$4 sm:$0xff]   ;;  %v2995_v53 = vld [vmem:[#allocation8 + $0x604] ss:$16 sps:$4 sm:$0xff]   ;;  %v2998_v54 = vld [vmem:[#allocation8 + $0x60c] ss:$16 sps:$4 sm:$0xff]  }
 0x182   : > { %v1794_v56 = vpop.f32.mrf.mxu0  ;;  %v1835_v57 = vpop.f32.mrf.mxu1 }
 0x183   : > { %v2993_v56 = vld [vmem:[#allocation8 + $0x600] ss:$16 sps:$4 sm:$0xff]   ;;  %v2996_v57 = vld [vmem:[#allocation8 + $0x608] ss:$16 sps:$4 sm:$0xff]  }
 0x184   : > { %v1795_v60 = vpop.f32.mrf.mxu0  ;;  %v1836_v61 = vpop.f32.mrf.mxu1 }
 0x185   : > { %v2999_v60 = vld [vmem:[#allocation8 + $0x7e0] ss:$16 sps:$4 sm:$0xff]   ;;  %v3002_v61 = vld [vmem:[#allocation8 + $0x7e8] ss:$16 sps:$4 sm:$0xff]  }
 0x187   : > { %1939 = vmatpush2.bf16.xpose.msra.mxu0 %v2909_v58  ;;  %1980 = vmatpush2.bf16.xpose.msra.mxu1 %v2912_v59  ;;  %v3001_v58 = vld [vmem:[#allocation8 + $0x7e4] ss:$16 sps:$4 sm:$0xff]   ;;  %v3004_v59 = vld [vmem:[#allocation8 + $0x7ec] ss:$16 sps:$4 sm:$0xff]  }
 0x188   : > { %1940 = vmatprep.subr.bf16.mxu0 %v2917_v62  ;;  %1981 = vmatprep.subr.bf16.mxu1 %v2920_v63  ;;  %v3007_v62 = vld [vmem:[#allocation8 + $0x7c4] ss:$16 sps:$4 sm:$0xff]   ;;  %v3010_v63 = vld [vmem:[#allocation8 + $0x7cc] ss:$16 sps:$4 sm:$0xff]  }
 0x18f   : > { %1941 = vmatpush2.bf16.xpose.msra.mxu0 %v2915_v0  ;;  %1982 = vmatpush2.bf16.xpose.msra.mxu1 %v2918_v1 }
 0x190   : > { %1942 = vmatprep.subr.bf16.mxu0 %v2923_v2  ;;  %1983 = vmatprep.subr.bf16.mxu1 %v2926_v3 }
 0x197   : > { %1943 = vmatpush2.bf16.xpose.msra.mxu0 %v2921_v4  ;;  %1984 = vmatpush2.bf16.xpose.msra.mxu1 %v2924_v5 }
 0x198   : > { %1944 = vmatprep.subr.bf16.mxu0 %v2929_v6  ;;  %1985 = vmatprep.subr.bf16.mxu1 %v2932_v9 }
 0x19f   : > { %1945 = vmatpush2.bf16.xpose.msra.mxu0 %v2927_v10  ;;  %1986 = vmatpush2.bf16.xpose.msra.mxu1 %v2930_v11  ;;  %v3005_v10 = vld [vmem:[#allocation8 + $0x7c0] ss:$16 sps:$4 sm:$0xff]   ;;  %v3008_v11 = vld [vmem:[#allocation8 + $0x7c8] ss:$16 sps:$4 sm:$0xff]  }
 0x1a0   : > { %1946 = vmatprep.subr.bf16.mxu0 %v2935_v12  ;;  %1987 = vmatprep.subr.bf16.mxu1 %v2938_v13 }
 0x1a7   : > { %1947 = vmatpush2.bf16.xpose.msra.mxu0 %v2933_v14  ;;  %1988 = vmatpush2.bf16.xpose.msra.mxu1 %v2936_v15  ;;  %v3013_v14 = vld [vmem:[#allocation8 + $0x7a4] ss:$16 sps:$4 sm:$0xff]   ;;  %v3016_v15 = vld [vmem:[#allocation8 + $0x7ac] ss:$16 sps:$4 sm:$0xff]  }
 0x1a8   : > { %1948 = vmatprep.subr.bf16.mxu0 %v2941_v16  ;;  %1989 = vmatprep.subr.bf16.mxu1 %v2944_v17  ;;  %v3011_v16 = vld [vmem:[#allocation8 + $0x7a0] ss:$16 sps:$4 sm:$0xff]   ;;  %v3014_v17 = vld [vmem:[#allocation8 + $0x7a8] ss:$16 sps:$4 sm:$0xff]  }
 0x1af   : > { %1949 = vmatpush2.bf16.xpose.msra.mxu0 %v2939_v18  ;;  %1990 = vmatpush2.bf16.xpose.msra.mxu1 %v2942_v19  ;;  %v3019_v18 = vld [vmem:[#allocation8 + $0x784] ss:$16 sps:$4 sm:$0xff]   ;;  %v3022_v19 = vld [vmem:[#allocation8 + $0x78c] ss:$16 sps:$4 sm:$0xff]  }
 0x1b0   : > { %1950 = vmatprep.subr.bf16.mxu0 %v2947_v20  ;;  %1991 = vmatprep.subr.bf16.mxu1 %v2950_v21  ;;  %v3017_v20 = vld [vmem:[#allocation8 + $0x780] ss:$16 sps:$4 sm:$0xff]   ;;  %v3020_v21 = vld [vmem:[#allocation8 + $0x788] ss:$16 sps:$4 sm:$0xff]  }
 0x1b7   : > { %1951 = vmatpush2.bf16.xpose.msra.mxu0 %v2945_v22  ;;  %1992 = vmatpush2.bf16.xpose.msra.mxu1 %v2948_v23  ;;  %v3025_v22 = vld [vmem:[#allocation8 + $0x764] ss:$16 sps:$4 sm:$0xff]   ;;  %v3028_v23 = vld [vmem:[#allocation8 + $0x76c] ss:$16 sps:$4 sm:$0xff]  }
 0x1b8   : > { %2002 = vmatprep.subr.bf16.mxu0 %v2953_v24  ;;  %2043 = vmatprep.subr.bf16.mxu1 %v2956_v25  ;;  %v3023_v24 = vld [vmem:[#allocation8 + $0x760] ss:$16 sps:$4 sm:$0xff]   ;;  %v3026_v25 = vld [vmem:[#allocation8 + $0x768] ss:$16 sps:$4 sm:$0xff]  }
 0x1be   : > { %1953 = vmatmul.mubr.bf16.vlgmr.msra.gmra.mxu0 %v3379_v7  ;;  %1994 = vmatmul.mubr.bf16.vlgmr.msra.gmra.mxu1 %v3383_v8 }
 0x1bf   : > { %2003 = vmatpush1.bf16.xpose.msra.mxu0 %v2951_v26  ;;  %2044 = vmatpush1.bf16.xpose.msra.mxu1 %v2954_v28  ;;  %v3031_v26 = vld [vmem:[#allocation8 + $0x744] ss:$16 sps:$4 sm:$0xff]   ;;  %v3034_v28 = vld [vmem:[#allocation8 + $0x74c] ss:$16 sps:$4 sm:$0xff]  }
 0x1c0   : > { %2004 = vmatprep.subr.bf16.mxu0 %v2959_v30  ;;  %2045 = vmatprep.subr.bf16.mxu1 %v2962_v31  ;;  %v3029_v30 = vld [vmem:[#allocation8 + $0x740] ss:$16 sps:$4 sm:$0xff]   ;;  %v3032_v31 = vld [vmem:[#allocation8 + $0x748] ss:$16 sps:$4 sm:$0xff]  }
 0x1c1   : > { %2034 = vmatprep.mubr.bf16.mxu0 %v3366_v27  ;;  %2075 = vmatprep.mubr.bf16.mxu1 %v3373_v29  ;;  %v2972_v27 = vld [vmem:[#allocation8 + $0x688] ss:$16 sps:$4 sm:$0xff]   ;;  %v2980_v29 = vld [vmem:[#allocation8 + $0x66c] ss:$16 sps:$4 sm:$0xff]  }
 0x1c7   : > { %2005 = vmatpush1.bf16.xpose.msra.mxu0 %v2957_v32  ;;  %2046 = vmatpush1.bf16.xpose.msra.mxu1 %v2960_v33  ;;  %v3037_v32 = vld [vmem:[#allocation8 + $0x724] ss:$16 sps:$4 sm:$0xff]   ;;  %v3040_v33 = vld [vmem:[#allocation8 + $0x72c] ss:$16 sps:$4 sm:$0xff]  }
 0x1c8   : > { %2006 = vmatprep.subr.bf16.mxu0 %v2965_v34  ;;  %2047 = vmatprep.subr.bf16.mxu1 %v2968_v35  ;;  %v3035_v34 = vld [vmem:[#allocation8 + $0x720] ss:$16 sps:$4 sm:$0xff]   ;;  %v3038_v35 = vld [vmem:[#allocation8 + $0x728] ss:$16 sps:$4 sm:$0xff]  }
 0x1cf   : > { %2007 = vmatpush1.bf16.xpose.msra.mxu0 %v2963_v36  ;;  %2048 = vmatpush1.bf16.xpose.msra.mxu1 %v2966_v37  ;;  %v3043_v36 = vld [vmem:[#allocation8 + $0x704] ss:$16 sps:$4 sm:$0xff]   ;;  %v3046_v37 = vld [vmem:[#allocation8 + $0x70c] ss:$16 sps:$4 sm:$0xff]  }
 0x1d0   : > { %2008 = vmatprep.subr.bf16.mxu0 %v2971_v38  ;;  %2049 = vmatprep.subr.bf16.mxu1 %v2974_v39  ;;  %v3041_v38 = vld [vmem:[#allocation8 + $0x700] ss:$16 sps:$4 sm:$0xff]   ;;  %v3044_v39 = vld [vmem:[#allocation8 + $0x708] ss:$16 sps:$4 sm:$0xff]  }
 0x1d7   : > { %2009 = vmatpush1.bf16.xpose.msra.mxu0 %v2969_v40  ;;  %2050 = vmatpush1.bf16.xpose.msra.mxu1 %v2972_v27 }
 0x1d8   : > { %2010 = vmatprep.subr.bf16.mxu0 %v2977_v41  ;;  %2051 = vmatprep.subr.bf16.mxu1 %v2980_v29 }
 0x1df   : > { %2011 = vmatpush1.bf16.xpose.msra.mxu0 %v2975_v42  ;;  %2052 = vmatpush1.bf16.xpose.msra.mxu1 %v2978_v43 }
 0x1e0   : > { %2012 = vmatprep.subr.bf16.mxu0 %v2983_v44  ;;  %2053 = vmatprep.subr.bf16.mxu1 %v2986_v45 }
 0x1e7   : > { %2013 = vmatpush1.bf16.xpose.msra.mxu0 %v2981_v46  ;;  %2054 = vmatpush1.bf16.xpose.msra.mxu1 %v2984_v47 }
 0x1e8   : > { %2014 = vmatprep.subr.bf16.mxu0 %v2989_v48  ;;  %2055 = vmatprep.subr.bf16.mxu1 %v2992_v49  ;;  %v3213_v48 = vmov -inf  }
 0x1e9   : > { %202 = vst.msk [vmem:[#allocation2] sm:$0xff] %vm201_vm0, %v3213_v48 }
 0x1ef   : > { %2015 = vmatpush1.bf16.xpose.msra.mxu0 %v2987_v50  ;;  %2056 = vmatpush1.bf16.xpose.msra.mxu1 %v2990_v51 }
 0x1f0   : > { %2016 = vmatprep.subr.bf16.mxu0 %v2995_v53  ;;  %2057 = vmatprep.subr.bf16.mxu1 %v2998_v54 }
 0x1f7   : > { %2017 = vmatpush1.bf16.xpose.msra.mxu0 %v2993_v56  ;;  %2058 = vmatpush1.bf16.xpose.msra.mxu1 %v2996_v57 }
 0x1f8   : > { %2018 = vmatprep.subr.bf16.mxu0 %v3001_v58  ;;  %2059 = vmatprep.subr.bf16.mxu1 %v3004_v59 }
 0x1fe   : > { %v1872_v0 = vpop.f32.mrf.mxu0  ;;  %v1913_v1 = vpop.f32.mrf.mxu1 }
 0x1ff   : > { %v3401_v2 = vadd.f32 %v1913_v1, %v1872_v0  ;;  %2019 = vmatpush2.bf16.xpose.msra.mxu0 %v2999_v60  ;;  %2060 = vmatpush2.bf16.xpose.msra.mxu1 %v3002_v61 }
 0x200   : > { %v1874_v3 = vpop.f32.mrf.mxu0  ;;  %v1915_v4 = vpop.f32.mrf.mxu1  ;;  %2020 = vmatprep.subr.bf16.mxu0 %v3007_v62  ;;  %2061 = vmatprep.subr.bf16.mxu1 %v3010_v63 }
 0x201   : > { %v3403_v5 = vadd.f32 %v1915_v4, %v1874_v3  ;;  %v3214_v3 = vmov 0   ;;  %v3215_v4 = vmov 0.0  }
 0x202   : > { %v1876_v6 = vpop.f32.mrf.mxu0  ;;  %v1917_v9 = vpop.f32.mrf.mxu1  ;;  %2657 = vset.pattern.permute.xlu0 %v3214_v3  ;;  %2658 = vset.pattern.permute.xlu1 %v3214_v3  ;;  %203 = vst.msk [vmem:[#allocation3] sm:$0xff] %vm201_vm0, %v3215_v4 }
 0x203   : > { %v2084_v6 = vld [vmem:[#allocation2] sm:$0xff] }
 0x204   : > { %v1877_v12 = vpop.f32.mrf.mxu0  ;;  %v1918_v13 = vpop.f32.mrf.mxu1 }
 0x207   : > { %2021 = vmatpush2.bf16.xpose.msra.mxu0 %v3005_v10  ;;  %2062 = vmatpush2.bf16.xpose.msra.mxu1 %v3008_v11 }
 0x208   : > { %2022 = vmatprep.subr.bf16.mxu0 %v3013_v14  ;;  %2063 = vmatprep.subr.bf16.mxu1 %v3016_v15 }
 0x20f   : > { %2023 = vmatpush2.bf16.xpose.msra.mxu0 %v3011_v16  ;;  %2064 = vmatpush2.bf16.xpose.msra.mxu1 %v3014_v17 }
 0x210   : > { %2024 = vmatprep.subr.bf16.mxu0 %v3019_v18  ;;  %2065 = vmatprep.subr.bf16.mxu1 %v3022_v19 }
 0x217   : > { %2025 = vmatpush2.bf16.xpose.msra.mxu0 %v3017_v20  ;;  %2066 = vmatpush2.bf16.xpose.msra.mxu1 %v3020_v21 }
 0x218   : > { %2026 = vmatprep.subr.bf16.mxu0 %v3025_v22  ;;  %2067 = vmatprep.subr.bf16.mxu1 %v3028_v23 }
 0x21f   : > { %2027 = vmatpush2.bf16.xpose.msra.mxu0 %v3023_v24  ;;  %2068 = vmatpush2.bf16.xpose.msra.mxu1 %v3026_v25 }
 0x220   : > { %2028 = vmatprep.subr.bf16.mxu0 %v3031_v26  ;;  %2069 = vmatprep.subr.bf16.mxu1 %v3034_v28 }
 0x227   : > { %2029 = vmatpush2.bf16.xpose.msra.mxu0 %v3029_v30  ;;  %2070 = vmatpush2.bf16.xpose.msra.mxu1 %v3032_v31 }
 0x228   : > { %2030 = vmatprep.subr.bf16.mxu0 %v3037_v32  ;;  %2071 = vmatprep.subr.bf16.mxu1 %v3040_v33 }
 0x22f   : > { %2031 = vmatpush2.bf16.xpose.msra.mxu0 %v3035_v34  ;;  %2072 = vmatpush2.bf16.xpose.msra.mxu1 %v3038_v35 }
 0x230   : > { %2032 = vmatprep.subr.bf16.mxu0 %v3043_v36  ;;  %2073 = vmatprep.subr.bf16.mxu1 %v3046_v37 }
 0x237   : > { %2033 = vmatpush2.bf16.xpose.msra.mxu0 %v3041_v38  ;;  %2074 = vmatpush2.bf16.xpose.msra.mxu1 %v3044_v39 }
 0x23e   : > { %2035 = vmatmul.mubr.bf16.vlgmr.msra.gmra.mxu0 %v3379_v7  ;;  %2076 = vmatmul.mubr.bf16.vlgmr.msra.gmra.mxu1 %v3383_v8 }
 0x27e   : > { %v1954_v40 = vpop.f32.mrf.mxu0  ;;  %v1995_v27 = vpop.f32.mrf.mxu1 }
 0x27f   : > { %v1996_v41 = vadd.f32 %v1995_v27, %v1954_v40 }
 0x280   : > { %v1956_v29 = vpop.f32.mrf.mxu0  ;;  %v1997_v42 = vpop.f32.mrf.mxu1 }
 0x281   : > { %v1998_v43 = vadd.f32 %v1997_v42, %v1956_v29  ;;  %v2085_v58 = vmax.f32 %v3393_v52, %v1996_v41  ;;  %v2124_v42 = vld [vmem:[#allocation3] sm:$0xff] }
 0x282   : > { %v1958_v44 = vpop.f32.mrf.mxu0  ;;  %v1999_v45 = vpop.f32.mrf.mxu1 }
 0x283   : > { %v2086_v8 = vmax.f32 %v3395_v55, %v1998_v43 }
 0x284   : > { %v1959_v46 = vpop.f32.mrf.mxu0  ;;  %v2000_v47 = vpop.f32.mrf.mxu1 }
 0x285   : > { %v2089_v63 = vmax.f32 %v2085_v58, %v2086_v8 }
 0x2fe   : > { %v2036_v49 = vpop.f32.mrf.mxu0  ;;  %v2077_v50 = vpop.f32.mrf.mxu1 }
 0x2ff   : > { %v2078_v51 = vadd.f32 %v2077_v50, %v2036_v49 }
 0x300   : > { %v2038_v7 = vpop.f32.mrf.mxu0  ;;  %v2079_v53 = vpop.f32.mrf.mxu1 }
 0x301   : > { %v2080_v54 = vadd.f32 %v2079_v53, %v2038_v7  ;;  %v2087_v59 = vmax.f32 %v3401_v2, %v2078_v51 }
 0x302   : > { %v2040_v56 = vpop.f32.mrf.mxu0  ;;  %v2081_v57 = vpop.f32.mrf.mxu1 }
 0x303   : > { %v2088_v60 = vmax.f32 %v3403_v5, %v2080_v54 }
 0x304   : > { %v2041_v61 = vpop.f32.mrf.mxu0  ;;  %v2082_v62 = vpop.f32.mrf.mxu1 }
 0x305   : > { %v2090_v0 = vmax.f32 %v2087_v59, %v2088_v60 }
 0x307   : > { %v2091_v1 = vmax.f32 %v2089_v63, %v2090_v0 }
 0x309   : > { %2092 = vmax.xlane.f32.xlu0 %v2091_v1 }
 0x392   : > { %v2093_v9 = vpop.xlane.xlu0 %2092 }
 0x393   : > { %v2094_v10 = vmax.f32 %v2084_v6, %v2093_v9 }
 0x395   : > { %v2125_v11 = vsub.f32 %v2084_v6, %v2094_v10  ;;  %2141 = vst.msk [vmem:[#allocation2] sm:$0xff] %vm201_vm0, %v2094_v10  ;;  %2144 = vst.msk [vmem:[#allocation4] sm:$0xff] %vm201_vm0, %v2094_v10  ;;  %2097 = vperm.xlu0 %2657, %v2094_v10  }
 0x39c   : > { %v2158_v44 = vld [vmem:[#allocation2] sm:$0xff]  ;;  %v2159_v45 = vld [vmem:[#allocation4] sm:$0xff] }
 0x39d   : > { %v2160_v48 = vsub.f32 %v2159_v45, %v2158_v44 }
 0x39f   : > { %v2161_v49 = vmul.f32 1.442695, %v2160_v48 }
 0x410   : > { %v2098_v12 = vpop.permute.xlu0 %2097 }
 0x411   : > { %v2100_v13 = vsub.f32 %v3393_v52, %v2098_v12  ;;  %v2101_v14 = vsub.f32 %v3395_v55, %v2098_v12  ;;  %v2102_v15 = vsub.f32 %v3401_v2, %v2098_v12  ;;  %v2103_v16 = vsub.f32 %v3403_v5, %v2098_v12 }
 0x412   : > { %v2104_v19 = vsub.f32 %v1996_v41, %v2098_v12  ;;  %v2105_v21 = vsub.f32 %v1998_v43, %v2098_v12  ;;  %v2106_v23 = vsub.f32 %v2078_v51, %v2098_v12  ;;  %v2107_v52 = vsub.f32 %v2080_v54, %v2098_v12 }
 0x413   : > { %v2108_v17 = vmul.f32 1.442695, %v2100_v13  ;;  %v2110_v18 = vmul.f32 1.442695, %v2101_v14  ;;  %v2112_v20 = vmul.f32 1.442695, %v2102_v15 }
 0x414   : > { %v2114_v22 = vmul.f32 1.442695, %v2103_v16  ;;  %v2116_v24 = vmul.f32 1.442695, %v2104_v19  ;;  %v2118_v25 = vmul.f32 1.442695, %v2105_v21 }
 0x415   : > { %3047 = vpow2.f32 %v2108_v17  ;;  %v2120_v55 = vmul.f32 1.442695, %v2106_v23  ;;  %v2122_v2 = vmul.f32 1.442695, %v2107_v52  ;;  %v2126_v41 = vmul.f32 1.442695, %v2125_v11 }
 0x416   : > { %3049 = vpow2.f32 %v2110_v18 }
 0x417   : > { %3051 = vpow2.f32 %v2112_v20 }
 0x418   : > { %3053 = vpow2.f32 %v2114_v22 }
 0x419   : > { %3055 = vpow2.f32 %v2116_v24 }
 0x41a   : > { %3057 = vpow2.f32 %v2118_v25 }
 0x41b   : > { %3059 = vpow2.f32 %v2120_v55 }
 0x41c   : > { %3061 = vpow2.f32 %v2122_v2 }
 0x41d   : > { %3063 = vpow2.f32 %v2126_v41 }
 0x41e   : > { %3065 = vpow2.f32 %v2161_v49 }
 0x422   : > { %v3048_v5 = vpop.eup %3047 }
 0x423   : > { %v3050_v26 = vpop.eup %3049 }
 0x424   : > { %v2129_v28 = vadd.f32 %v3050_v26, %v3048_v5  ;;  %v3052_v30 = vpop.eup %3051 }
 0x425   : > { %v3054_v32 = vpop.eup %3053 }
 0x426   : > { %v2130_v31 = vadd.f32 %v3052_v30, %v2129_v28  ;;  %v3056_v34 = vpop.eup %3055 }
 0x427   : > { %v3058_v36 = vpop.eup %3057 }
 0x428   : > { %v2131_v33 = vadd.f32 %v3054_v32, %v2130_v31  ;;  %v3060_v38 = vpop.eup %3059 }
 0x429   : > { %v3062_v40 = vpop.eup %3061 }
 0x42a   : > { %v2132_v35 = vadd.f32 %v3056_v34, %v2131_v33  ;;  %v3064_v29 = vpop.eup %3063 }
 0x42b   : > { %v2128_v43 = vmul.f32 %v3064_v29, %v2124_v42  ;;  %v3066_v51 = vpop.eup %3065 }
 0x42c   : > { %v2133_v37 = vadd.f32 %v3058_v36, %v2132_v35 }
 0x42e   : > { %v2134_v39 = vadd.f32 %v3060_v38, %v2133_v37 }
 0x430   : > { %v2135_v27 = vadd.f32 %v3062_v40, %v2134_v39 }
 0x432   : > { %2136 = vadd.xlane.f32.xlu1 %v2135_v27 }
 0x4bb   : > { %v2137_v46 = vpop.xlane.xlu1 %2136 }
 0x4bc   : > { %v2138_v47 = vadd.f32 %v2137_v46, %v2128_v43 }
 0x4be   : > { %2140 = vst.msk [vmem:[#allocation3] sm:$0xff] %vm201_vm0, %v2138_v47 }
 0x4c5   : > { %v2156_v50 = vld [vmem:[#allocation3] sm:$0xff] }
 0x4c6   : > { %3067 = vrcp.f32 %v2156_v50 }
 0x4d3   : > { %v3068_v7 = vpop.eup %3067 }
 0x4d4   : > { %v2163_v53 = vmul.f32 %v3068_v7, %v3066_v51 }
 0x4d6   : > { %2174 = vperm.xlu1 %2658, %v2163_v53  }
 0x551   : > { %v2175_v8 = vpop.permute.xlu1 %2174 }
 0x552   : > { %v2177_v54 = vmul.f32 %v3048_v5, %v2175_v8  ;;  %v2178_v56 = vmul.f32 %v3050_v26, %v2175_v8  ;;  %v2179_v57 = vmul.f32 %v3052_v30, %v2175_v8  ;;  %v2180_v58 = vmul.f32 %v3054_v32, %v2175_v8 }
 0x553   : > { %v2181_v59 = vmul.f32 %v3056_v34, %v2175_v8  ;;  %v2182_v60 = vmul.f32 %v3058_v36, %v2175_v8  ;;  %v2183_v61 = vmul.f32 %v3060_v38, %v2175_v8  ;;  %v2184_v62 = vmul.f32 %v3062_v40, %v2175_v8 }
 0x554   : > { %2185 = vst [vmem:[%s195_s21] sm:$0xff] %v2177_v54  ;;  %2186 = vst [vmem:[%s195_s21 + $0x8] sm:$0xff] %v2178_v56 }
 0x555   : > { %2187 = vst [vmem:[%s195_s21 + $0x10] sm:$0xff] %v2179_v57  ;;  %2188 = vst [vmem:[%s195_s21 + $0x18] sm:$0xff] %v2180_v58 }
 0x556   : > { %2189 = vst [vmem:[%s195_s21 + $0x20] sm:$0xff] %v2181_v59  ;;  %2190 = vst [vmem:[%s195_s21 + $0x28] sm:$0xff] %v2182_v60 }
 0x557   : > { %2191 = vst [vmem:[%s195_s21 + $0x30] sm:$0xff] %v2183_v61  ;;  %2192 = vst [vmem:[%s195_s21 + $0x38] sm:$0xff] %v2184_v62 }
 0x558   : > { %3136 = shalt.err (!%p3133_p5)
}
 0x559   : > { %s3137_s30 = scalar_lea.hbm %s3425_s26, 1024  ;;  %s3141_s4 = scalar_lea.hbm %s3475_s2, 2048 }
 0x55a   : > { %p3138_p7 = scmp.ne.s32.totalorder %s3425_s26, %s3137_s30  ;;  %p3142_p9 = scmp.lt.s32.totalorder %s3425_s26, %s3475_s2 }
 0x55b   : > { %p3143_p11 = scmp.lt.s32.totalorder %s3141_s4, %s3137_s30 }
 0x55c   : > { %p3139_p6 = pnand %p3138_p7, %p3319_p13 }
 0x55d   : > { %p3144_p12 = por %p3143_p11, %p3142_p9 }
 0x55e   : > { %p3140_p4 = pneg %p3139_p6 }
 0x560   : > { %p3145_p1 = pnand %p3144_p12, %p3140_p4 }
 0x562   : > { %3148 = shalt.err (!%p3145_p1)
}
 0x563   : > { %2585 = dma.vmem_to_hbm [thread:$0]  (%p3319_p13), %s3427_s22, 1024, %s3425_s26, %s2194_s12  }
 0x564 PF: > { %s2220_s16 = sand.u32 1, %s3187_s9   ;;  %p3487_p8 = scmp.ne.s32.totalorder %s3480_s20, 0 }
 0x565   : > { %p3488_p10 = scmp.ge.s32.totalorder %s3207_s14, 2  ;;  %s2221_s17 = scalar_lea.sflag [#allocation7], %s2220_s16 }
 0x567   : > { %p2596_p0 = pnand %p3488_p10, %p3487_p8 }
 0x569   : > { %p2597_p2 = pneg %p2596_p0 }
 0x56b   : > { %3182 = dma.done.wait (%p2597_p2), %s2221_s17, 1024  }
 0x56c   : > { %3184 = vsyncadd (%p2597_p2), %s2221_s17, 4294966272  ;;  %s19_s14 = sadd.s32 1, %s3207_s14   ;;  %s3489_s9 = smov %s3191_s10 }
 0x56d   : > { %p16_p3 = scmp.ge.s32.totalorder %s19_s14, 4   ;;  %s3490_s10 = smov %s3195_s11 }
 0x56e   : > { %s3491_s11 = smov %s3328_s15  ;;  %s3492_s12 = smov %s3203_s13 }
 0x56f   : > { %s3493_s13 = smov %s3495_s25  ;;  %18 = sbr.rel (!%p16_p3) target bundleno = 7 (0x7), region = 87 }
 0x574   :  { %2226 = vsyncpa [#allocation6], 1 }
 0x575   :  { %2228 = vsyncpa [#allocation6 + $0x1], 1 }
 0x576   :  { %2229 = vsyncpa [#allocation9], 1 }
 0x577   :  { %2230 = vsyncpa [#allocation7], 1 }
 0x578   :  { %2232 = vsyncpa [#allocation7 + $0x1], 1 }

</bundles_post_ra>
